<compile_context>
chip_gen: v5e
topology: v5e:2x2
jax: 0.10.0
libtpu: 0.0.40
codegen_flags: <defaults>
</compile_context>

<pallas_src>
import functools

import jax
import jax.numpy as jnp
from jax import lax
from jax.experimental import pallas as pl
from jax.experimental.pallas import tpu as pltpu

_MIB = 1024 * 1024


def _upsample_conv_kernel(x_main_ref, x_top_ref, x_bot_ref, w_mid_ref,
                          w_left_ref, w_right_ref, b_ref, o_ref, xw_ref,
                          *, r_rows, width, cin, cout):
    """Fused nearest-2x-upsample + 3x3 'same' conv on one row tile.

    x_main_ref:  (1, r_rows, W, Cin)       original-resolution input rows
    x_top_ref:   (1, 1, W, Cin)            row above the tile (ignored at t==0)
    x_bot_ref:   (1, 1, W, Cin)            row below the tile (ignored at t==T-1)
    w_mid_ref:   (2, 2, Cin, 2*Cout)       centre-column taps [rp, a] (both parities)
    w_left_ref:  (2, 2, Cin, Cout)         source-col j-1 taps (col parity 0)
    w_right_ref: (2, 2, Cin, Cout)         source-col j+1 taps (col parity 1)
    b_ref:       (1, 2*Cout)               bias duplicated for both col parities
    o_ref:       (1, r_rows, 2, W, 2*Cout) element (i, rp, j, rq*Cout+co) is the
                                           final output pixel (2i+rp, 2j+rq, co)
    xw_ref:      VMEM scratch (r_rows+2, W, Cin) in the compute dtype
    """
    t = pl.program_id(1)
    last = pl.num_programs(1) - 1
    cdt = xw_ref.dtype

    # ---- rows-only padded window: aligned leading-dim stores, halos via pl.when ----
    xw_ref[1:r_rows + 1] = x_main_ref[0].astype(cdt)

    @pl.when(t == 0)
    def _():
        xw_ref[0] = jnp.zeros((width, cin), cdt)

    @pl.when(t > 0)
    def _():
        xw_ref[0] = x_top_ref[0, 0].astype(cdt)

    @pl.when(t == last)
    def _():
        xw_ref[r_rows + 1] = jnp.zeros((width, cin), cdt)

    @pl.when(t < last)
    def _():
        xw_ref[r_rows + 1] = x_bot_ref[0, 0].astype(cdt)

    m2 = (r_rows + 2) * width
    # width is untiled, so this reshape is a contiguous collapse of leading dims.
    center = xw_ref[...].reshape(m2, cin)

    # Column-shifted operands via XLU sublane rolls (jnp.roll semantics:
    # roll(+1)[k] = center[k-1]).  The wrapped-around column corresponds to the
    # conv zero padding and is masked to zero; the mask is built once per step.
    col = lax.broadcasted_iota(jnp.int32, (r_rows + 2, width, cin), 1)
    col = col.reshape(m2, cin)
    zeros = jnp.zeros_like(center)
    left = jnp.where(col == 0, zeros, pltpu.roll(center, 1, axis=0))
    right = jnp.where(col == width - 1, zeros,
                      pltpu.roll(center, m2 - 1, axis=0))

    bias2 = b_ref[...].astype(jnp.float32)          # (1, 2*Cout)

    def lhs(op, o):                                  # rows [o, o + r_rows) of the window
        return op[o * width:(o + r_rows) * width, :]

    # ---- polyphase conv: per output-row parity, 6 MXU matmuls, f32 accum ----
    for rp in range(2):
        acc = jnp.dot(lhs(center, rp), w_mid_ref[rp, 0],
                      preferred_element_type=jnp.float32)
        acc = acc + jnp.dot(lhs(center, rp + 1), w_mid_ref[rp, 1],
                            preferred_element_type=jnp.float32)
        p_lo = jnp.dot(lhs(left, rp), w_left_ref[rp, 0],
                       preferred_element_type=jnp.float32)
        p_lo = p_lo + jnp.dot(lhs(left, rp + 1), w_left_ref[rp, 1],
                              preferred_element_type=jnp.float32)
        p_hi = jnp.dot(lhs(right, rp), w_right_ref[rp, 0],
                       preferred_element_type=jnp.float32)
        p_hi = p_hi + jnp.dot(lhs(right, rp + 1), w_right_ref[rp, 1],
                              preferred_element_type=jnp.float32)
        out = acc + jnp.concatenate([p_lo, p_hi], axis=-1) + bias2
        # Dense store of all rows at parity rp; lane order already final.
        o_ref[0, :, rp, :, :] = out.reshape(r_rows, width,
                                            2 * cout).astype(o_ref.dtype)


def _pack_polyphase(weight_oihw, bias, compute_dtype):
    """Fold nearest-2x upsample + 3x3 conv into polyphase weights (no zero blocks).

    Returns:
      w_mid:   (2, 2, Cin, 2*Cout)  centre column tap (source col j), both parities
      w_left:  (2, 2, Cin, Cout)    source col j-1 tap -> output col parity 0
      w_right: (2, 2, Cin, Cout)    source col j+1 tap -> output col parity 1
      bias2:   (1, 2*Cout)          bias duplicated for both column parities
    """
    cout = weight_oihw.shape[0]
    w = jnp.transpose(weight_oihw, (2, 3, 1, 0)).astype(jnp.float32)  # (kh,kw,Cin,Cout)
    # Row-tap combinations along kh, indexed [rp, a]:
    #   rp=0: a=0 -> kh0,     a=1 -> kh1+kh2   (source rows i-1, i)
    #   rp=1: a=0 -> kh0+kh1, a=1 -> kh2       (source rows i,   i+1)
    wr = jnp.stack([jnp.stack([w[0], w[1] + w[2]], axis=0),
                    jnp.stack([w[0] + w[1], w[2]], axis=0)], axis=0)
    # wr: (2, 2, 3, Cin, Cout) with axes [rp, a, kw, cin, cout]
    p00 = wr[:, :, 0]                 # rq=0, source col j-1
    p01 = wr[:, :, 1] + wr[:, :, 2]   # rq=0, source col j
    p10 = wr[:, :, 0] + wr[:, :, 1]   # rq=1, source col j
    p11 = wr[:, :, 2]                 # rq=1, source col j+1
    w_mid = jnp.concatenate([p01, p10], axis=-1).astype(compute_dtype)
    w_left = p00.astype(compute_dtype)
    w_right = p11.astype(compute_dtype)
    bias2 = jnp.concatenate([bias, bias]).reshape(1, 2 * cout).astype(jnp.float32)
    return w_mid, w_left, w_right, bias2


def upsample_forward_nhwc(x_nhwc, weight_oihw, bias, *, use_conv=True,
                          padding=1, target_block_m=512,
                          compute_dtype=jnp.bfloat16):
    """Upsample forward in NHWC (preferred hot-path API: no transposes)."""
    if not use_conv:
        # Pure nearest-neighbour replication: layout glue, leave to XLA.
        return jnp.repeat(jnp.repeat(x_nhwc, 2, axis=1), 2, axis=2)
    assert padding == 1, "TODO(synk): only padding=1 ('same' 3x3) is implemented"

    n, h, w, cin = x_nhwc.shape
    cout = weight_oihw.shape[0]
    assert weight_oihw.shape == (cout, cin, 3, 3)

    w_mid, w_left, w_right, bias2 = _pack_polyphase(weight_oihw, bias,
                                                    compute_dtype)

    in_bytes = x_nhwc.dtype.itemsize
    cdt_bytes = jnp.dtype(compute_dtype).itemsize

    # ---- per-generation VMEM budget (v7x: 64 MiB/core, v5e/v6e: 128 MiB) ----
    try:
        vmem_cap = int(pltpu.get_tpu_info().vmem_capacity_bytes)
        vmem_cap = max(32 * _MIB, min(vmem_cap, 128 * _MIB))
    except Exception:  # pragma: no cover - conservative fallback
        vmem_cap = 64 * _MIB
    sizing_budget = max(32 * _MIB, int(0.5 * vmem_cap))

    weights_bytes = (2 * (w_mid.size + w_left.size + w_right.size) * cdt_bytes
                     + 2 * bias2.size * 4)

    def step_footprint(r):
        m = r * w
        m2 = (r + 2) * w
        return (weights_bytes
                + 2 * r * w * cin * in_bytes            # main tile (double-buffered)
                + 2 * 2 * w * cin * in_bytes            # halo rows (double-buffered)
                + 2 * r * 2 * w * 2 * cout * in_bytes   # output block (double-buffered)
                + m2 * cin * cdt_bytes                  # scratch window
                + 3 * m2 * cin * cdt_bytes              # window + rolled operand values
                + m2 * cin * 4                          # column-index iota
                + 4 * m * cout * 4)                     # f32 acc + partial sums

    target_rows = max(1, min(h, target_block_m // max(w, 1)))
    divisors = [d for d in range(1, h + 1) if h % d == 0]
    fitting = [d for d in divisors
               if d <= target_rows and step_footprint(d) <= sizing_budget]
    if not fitting:
        # TODO(synk): implement Cout/Cin weight streaming (extra grid axis) so
        # >=1024-channel layers fit v7x's 64 MiB VMEM; fail loudly until then.
        raise ValueError(
            "Upsample Pallas kernel does not fit the VMEM budget "
            f"(cin={cin}, cout={cout}); needs weight streaming.")
    r_rows = max(fitting)
    n_tiles = h // r_rows
    need = step_footprint(r_rows)
    vmem_limit = int(min(0.9 * vmem_cap, max(32 * _MIB, 1.5 * need)))

    kernel = functools.partial(_upsample_conv_kernel, r_rows=r_rows, width=w,
                               cin=cin, cout=cout)

    # No zero-weight blocks any more: 16 Cin*Cout MACs per input pixel.
    flops = 2 * 16 * n * h * w * cin * cout
    bytes_accessed = int(x_nhwc.size * in_bytes
                         + n * h * 2 * w * 2 * cout * in_bytes
                         + (w_mid.size + w_left.size + w_right.size) * cdt_bytes
                         + bias2.size * 4)

    out5 = pl.pallas_call(
        kernel,
        out_shape=jax.ShapeDtypeStruct((n, h, 2, w, 2 * cout), x_nhwc.dtype),
        grid=(n, n_tiles),
        in_specs=[
            # main rows of the tile
            pl.BlockSpec((1, r_rows, w, cin), lambda b, t: (b, t, 0, 0)),
            # 1-row halos (index clamped at the image border, zeroed in-kernel)
            pl.BlockSpec((1, 1, w, cin),
                         lambda b, t: (b, jnp.maximum(t * r_rows - 1, 0), 0, 0)),
            pl.BlockSpec((1, 1, w, cin),
                         lambda b, t: (b, jnp.minimum((t + 1) * r_rows, h - 1),
                                       0, 0)),
            # packed polyphase weights + bias: constant index maps -> DMA'd once
            pl.BlockSpec((2, 2, cin, 2 * cout), lambda b, t: (0, 0, 0, 0)),
            pl.BlockSpec((2, 2, cin, cout), lambda b, t: (0, 0, 0, 0)),
            pl.BlockSpec((2, 2, cin, cout), lambda b, t: (0, 0, 0, 0)),
            pl.BlockSpec((1, 2 * cout), lambda b, t: (0, 0)),
        ],
        out_specs=pl.BlockSpec((1, r_rows, 2, w, 2 * cout),
                               lambda b, t: (b, t, 0, 0, 0)),
        scratch_shapes=[pltpu.VMEM((r_rows + 2, w, cin), compute_dtype)],
        compiler_params=pltpu.CompilerParams(
            # no cross-step state (scratch fully rewritten each step), so both
            # axes are safe to shard across v7x's two TensorCores.
            dimension_semantics=("parallel", "parallel"),
            vmem_limit_bytes=vmem_limit),
        cost_estimate=pl.CostEstimate(flops=flops, transcendentals=0,
                                      bytes_accessed=bytes_accessed),
    )(x_nhwc, x_nhwc, x_nhwc, w_mid, w_left, w_right, bias2)

    # (N, H, 2, W, 2*Cout) -> (N, 2H, 2W, Cout) is row-major compatible:
    # a free reshape (no transpose, no extra HBM pass).
    return out5.reshape(n, 2 * h, 2 * w, cout)


def upsample_forward(x_nchw, weight_oihw, bias, *, use_conv=True, padding=1,
                     target_block_m=512, compute_dtype=jnp.bfloat16):
    """Drop-in NCHW forward matching the PyTorch module.

    NOTE: the two transposes below are full HBM passes over the activations and
    exist only for PyTorch-layout parity; NHWC pipelines should call
    upsample_forward_nhwc directly (no transposes anywhere on the hot path).
    """
    if not use_conv:
        return jnp.repeat(jnp.repeat(x_nchw, 2, axis=2), 2, axis=3)
    x_nhwc = jnp.transpose(x_nchw, (0, 2, 3, 1))
    out_nhwc = upsample_forward_nhwc(x_nhwc, weight_oihw, bias, use_conv=True,
                                     padding=padding,
                                     target_block_m=target_block_m,
                                     compute_dtype=compute_dtype)
    return jnp.transpose(out_nhwc, (0, 3, 1, 2))


def _reference_forward(x_nchw, weight_oihw, bias, padding=1):
    """Pure-JAX f32 reference (nearest 2x upsample + conv) for correctness."""
    x_up = jnp.repeat(jnp.repeat(x_nchw, 2, axis=2), 2, axis=3)
    out = lax.conv_general_dilated(
        x_up, weight_oihw, window_strides=(1, 1),
        padding=((padding, padding), (padding, padding)),
        dimension_numbers=("NCHW", "OIHW", "NCHW"))
    return out + bias.reshape(1, -1, 1, 1)


if __name__ == "__main__":
    # Module config: Upsample(channels=4, use_conv=True, dims=2) -> out_channels=4.
    N, C, H, W = 2, 4, 16, 16
    Cout = C

    key = jax.random.PRNGKey(0)
    kx, kw, kb = jax.random.split(key, 3)

    x = jax.random.normal(kx, (N, C, H, W), dtype=jnp.float32)
    fan_in = C * 3 * 3
    bound = 1.0 / jnp.sqrt(fan_in)
    weight = jax.random.uniform(kw, (Cout, C, 3, 3), minval=-bound,
                                maxval=bound, dtype=jnp.float32)
    bias = jax.random.uniform(kb, (Cout,), minval=-bound, maxval=bound,
                              dtype=jnp.float32)

    ref = _reference_forward(x, weight, bias, padding=1)

    # f32 compute path with a small row tile (multi-tile grid -> exercises the
    # halo DMAs and pl.when border handling): tight numerical check.
    fwd_f32 = jax.jit(functools.partial(upsample_forward, use_conv=True,
                                        padding=1, target_block_m=64,
                                        compute_dtype=jnp.float32))
    out_f32 = jax.block_until_ready(fwd_f32(x, weight, bias))
    assert out_f32.shape == (N, Cout, 2 * H, 2 * W), out_f32.shape
    assert jnp.allclose(out_f32, ref, atol=1e-4, rtol=1e-4), (
        float(jnp.max(jnp.abs(out_f32 - ref))))

    # Default bf16 MXU path with the auto-derived (larger) tile: looser tolerance.
    fwd_bf16 = jax.jit(functools.partial(upsample_forward, use_conv=True,
                                         padding=1,
                                         compute_dtype=jnp.bfloat16))
    out_bf16 = jax.block_until_ready(fwd_bf16(x, weight, bias))
    assert out_bf16.shape == (N, Cout, 2 * H, 2 * W), out_bf16.shape
    assert jnp.allclose(out_bf16, ref, atol=5e-2, rtol=5e-2), (
        float(jnp.max(jnp.abs(out_bf16 - ref))))

    print("KERNEL_OK")
</pallas_src>

<mosaic_0001>
module attributes {stable_mosaic.version = 11 : i64} {
  func.func @_upsample_conv_kernel(%arg0: i32, %arg1: i32, %arg2: memref<1x4x16x4xf32, #tpu.memory_space<vmem>>, %arg3: memref<1x1x16x4xf32, #tpu.memory_space<vmem>>, %arg4: memref<1x1x16x4xf32, #tpu.memory_space<vmem>>, %arg5: memref<2x2x4x8xf32, #tpu.memory_space<vmem>>, %arg6: memref<2x2x4x4xf32, #tpu.memory_space<vmem>>, %arg7: memref<2x2x4x4xf32, #tpu.memory_space<vmem>>, %arg8: memref<1x8xf32, #tpu.memory_space<vmem>>, %arg9: memref<1x4x2x16x8xf32, #tpu.memory_space<vmem>>, %arg10: memref<6x16x4xf32, #tpu.memory_space<vmem>>) attributes {dimension_semantics = [#tpu.dimension_semantics<parallel>, #tpu.dimension_semantics<parallel>], iteration_bounds = array<i64: 2, 4>, scalar_prefetch = 0 : i64, scratch_operands = 1 : i64, tpu.core_type = #tpu.core_type<tc>, window_params = [{transform_indices = @transform_0, window_bounds = array<i64: 1, 4, 16, 4>}, {transform_indices = @transform_1, window_bounds = array<i64: 1, 1, 16, 4>}, {transform_indices = @transform_2, window_bounds = array<i64: 1, 1, 16, 4>}, {pipeline_mode = #tpu.pipeline_mode<synchronous>, transform_indices = @transform_3, window_bounds = array<i64: 2, 2, 4, 8>}, {pipeline_mode = #tpu.pipeline_mode<synchronous>, transform_indices = @transform_4, window_bounds = array<i64: 2, 2, 4, 4>}, {pipeline_mode = #tpu.pipeline_mode<synchronous>, transform_indices = @transform_5, window_bounds = array<i64: 2, 2, 4, 4>}, {pipeline_mode = #tpu.pipeline_mode<synchronous>, transform_indices = @transform_6, window_bounds = array<i64: 1, 8>}, {transform_indices = @transform_7, window_bounds = array<i64: 1, 4, 2, 16, 8>}]} {
    %c0 = arith.constant 0 : index
    %c0_0 = arith.constant 0 : index
    %c0_1 = arith.constant 0 : index
    %c0_2 = arith.constant 0 : index
    %0 = vector.load %arg2[%c0, %c0_0, %c0_1, %c0_2] : memref<1x4x16x4xf32, #tpu.memory_space<vmem>>, vector<1x4x16x4xf32>
    %1 = vector.shape_cast %0 : vector<1x4x16x4xf32> to vector<4x16x4xf32>
    %c1 = arith.constant 1 : index
    %c0_3 = arith.constant 0 : index
    %c0_4 = arith.constant 0 : index
    %2 = vector.load %arg10[%c1, %c0_3, %c0_4] : memref<6x16x4xf32, #tpu.memory_space<vmem>>, vector<4x16x4xf32>
    tpu.vector_store %arg10[%c1, %c0_3, %c0_4], %1 {strides = array<i32>} : memref<6x16x4xf32, #tpu.memory_space<vmem>>, vector<4x16x4xf32>,
    %c0_i32 = arith.constant 0 : i32
    %3 = arith.cmpi eq, %arg1, %c0_i32 : i32
    %4 = arith.extui %3 : i1 to i32
    %c0_i32_5 = arith.constant 0 : i32
    %5 = arith.cmpi ne, %4, %c0_i32_5 : i32
    scf.if %5 {
      %cst_87 = arith.constant 0.000000e+00 : f32
      %99 = vector.broadcast %cst_87 : f32 to vector<16x4xf32>
      %c0_88 = arith.constant 0 : index
      %c0_89 = arith.constant 0 : index
      %c0_90 = arith.constant 0 : index
      %100 = vector.load %arg10[%c0_88, %c0_89, %c0_90] : memref<6x16x4xf32, #tpu.memory_space<vmem>>, vector<1x16x4xf32>
      %101 = vector.shape_cast %100 : vector<1x16x4xf32> to vector<16x4xf32>
      %102 = vector.shape_cast %99 : vector<16x4xf32> to vector<1x16x4xf32>
      tpu.vector_store %arg10[%c0_88, %c0_89, %c0_90], %102 {strides = array<i32>} : memref<6x16x4xf32, #tpu.memory_space<vmem>>, vector<1x16x4xf32>,
    } else {
    }
    %c0_i32_6 = arith.constant 0 : i32
    %6 = arith.cmpi sgt, %arg1, %c0_i32_6 : i32
    %7 = arith.extui %6 : i1 to i32
    %c0_i32_7 = arith.constant 0 : i32
    %8 = arith.cmpi ne, %7, %c0_i32_7 : i32
    scf.if %8 {
      %c0_87 = arith.constant 0 : index
      %c0_88 = arith.constant 0 : index
      %c0_89 = arith.constant 0 : index
      %c0_90 = arith.constant 0 : index
      %99 = vector.load %arg3[%c0_87, %c0_88, %c0_89, %c0_90] : memref<1x1x16x4xf32, #tpu.memory_space<vmem>>, vector<1x1x16x4xf32>
      %100 = vector.shape_cast %99 : vector<1x1x16x4xf32> to vector<16x4xf32>
      %c0_91 = arith.constant 0 : index
      %c0_92 = arith.constant 0 : index
      %c0_93 = arith.constant 0 : index
      %101 = vector.load %arg10[%c0_91, %c0_92, %c0_93] : memref<6x16x4xf32, #tpu.memory_space<vmem>>, vector<1x16x4xf32>
      %102 = vector.shape_cast %101 : vector<1x16x4xf32> to vector<16x4xf32>
      %103 = vector.shape_cast %100 : vector<16x4xf32> to vector<1x16x4xf32>
      tpu.vector_store %arg10[%c0_91, %c0_92, %c0_93], %103 {strides = array<i32>} : memref<6x16x4xf32, #tpu.memory_space<vmem>>, vector<1x16x4xf32>,
    } else {
    }
    %c3_i32 = arith.constant 3 : i32
    %9 = arith.cmpi eq, %arg1, %c3_i32 : i32
    %10 = arith.extui %9 : i1 to i32
    %c0_i32_8 = arith.constant 0 : i32
    %11 = arith.cmpi ne, %10, %c0_i32_8 : i32
    scf.if %11 {
      %cst_87 = arith.constant 0.000000e+00 : f32
      %99 = vector.broadcast %cst_87 : f32 to vector<16x4xf32>
      %c5 = arith.constant 5 : index
      %c0_88 = arith.constant 0 : index
      %c0_89 = arith.constant 0 : index
      %100 = vector.load %arg10[%c5, %c0_88, %c0_89] : memref<6x16x4xf32, #tpu.memory_space<vmem>>, vector<1x16x4xf32>
      %101 = vector.shape_cast %100 : vector<1x16x4xf32> to vector<16x4xf32>
      %102 = vector.shape_cast %99 : vector<16x4xf32> to vector<1x16x4xf32>
      tpu.vector_store %arg10[%c5, %c0_88, %c0_89], %102 {strides = array<i32>} : memref<6x16x4xf32, #tpu.memory_space<vmem>>, vector<1x16x4xf32>,
    } else {
    }
    %c3_i32_9 = arith.constant 3 : i32
    %12 = arith.cmpi slt, %arg1, %c3_i32_9 : i32
    %13 = arith.extui %12 : i1 to i32
    %c0_i32_10 = arith.constant 0 : i32
    %14 = arith.cmpi ne, %13, %c0_i32_10 : i32
    scf.if %14 {
      %c0_87 = arith.constant 0 : index
      %c0_88 = arith.constant 0 : index
      %c0_89 = arith.constant 0 : index
      %c0_90 = arith.constant 0 : index
      %99 = vector.load %arg4[%c0_87, %c0_88, %c0_89, %c0_90] : memref<1x1x16x4xf32, #tpu.memory_space<vmem>>, vector<1x1x16x4xf32>
      %100 = vector.shape_cast %99 : vector<1x1x16x4xf32> to vector<16x4xf32>
      %c5 = arith.constant 5 : index
      %c0_91 = arith.constant 0 : index
      %c0_92 = arith.constant 0 : index
      %101 = vector.load %arg10[%c5, %c0_91, %c0_92] : memref<6x16x4xf32, #tpu.memory_space<vmem>>, vector<1x16x4xf32>
      %102 = vector.shape_cast %101 : vector<1x16x4xf32> to vector<16x4xf32>
      %103 = vector.shape_cast %100 : vector<16x4xf32> to vector<1x16x4xf32>
      tpu.vector_store %arg10[%c5, %c0_91, %c0_92], %103 {strides = array<i32>} : memref<6x16x4xf32, #tpu.memory_space<vmem>>, vector<1x16x4xf32>,
    } else {
    }
    %c0_11 = arith.constant 0 : index
    %c0_12 = arith.constant 0 : index
    %c0_13 = arith.constant 0 : index
    %15 = vector.load %arg10[%c0_11, %c0_12, %c0_13] : memref<6x16x4xf32, #tpu.memory_space<vmem>>, vector<6x16x4xf32>
    %16 = vector.shape_cast %15 : vector<6x16x4xf32> to vector<96x4xf32>
    %17 = tpu.iota {dimensions = array<i32: 1>} : vector<6x16x4xi32>
    %18 = vector.shape_cast %17 : vector<6x16x4xi32> to vector<96x4xi32>
    %cst = arith.constant 0.000000e+00 : f32
    %19 = vector.broadcast %cst : f32 to vector<96x4xf32>
    %c0_i32_14 = arith.constant 0 : i32
    %20 = vector.broadcast %c0_i32_14 : i32 to vector<96x4xi32>
    %21 = arith.cmpi eq, %18, %20 : vector<96x4xi32>
    %c1_i32 = arith.constant 1 : i32
    %22 = tpu.dynamic_rotate %16 by %c1_i32 dim 0 : vector<96x4xf32>, i32 -> vector<96x4xf32>
    %23 = arith.select %21, %19, %22 : vector<96x4xi1>, vector<96x4xf32>
    %c15_i32 = arith.constant 15 : i32
    %24 = vector.broadcast %c15_i32 : i32 to vector<96x4xi32>
    %25 = arith.cmpi eq, %18, %24 : vector<96x4xi32>
    %c95_i32 = arith.constant 95 : i32
    %26 = tpu.dynamic_rotate %16 by %c95_i32 dim 0 : vector<96x4xf32>, i32 -> vector<96x4xf32>
    %27 = arith.select %25, %19, %26 : vector<96x4xi1>, vector<96x4xf32>
    %c0_15 = arith.constant 0 : index
    %c0_16 = arith.constant 0 : index
    %28 = vector.load %arg8[%c0_15, %c0_16] : memref<1x8xf32, #tpu.memory_space<vmem>>, vector<1x8xf32>
    %29 = vector.extract_strided_slice %16 {offsets = [0, 0], sizes = [64, 4], strides = [1, 1]} : vector<96x4xf32> to vector<64x4xf32>
    %c0_17 = arith.constant 0 : index
    %c0_18 = arith.constant 0 : index
    %c0_19 = arith.constant 0 : index
    %c0_20 = arith.constant 0 : index
    %30 = vector.load %arg5[%c0_17, %c0_18, %c0_19, %c0_20] : memref<2x2x4x8xf32, #tpu.memory_space<vmem>>, vector<1x1x4x8xf32>
    %31 = vector.shape_cast %30 : vector<1x1x4x8xf32> to vector<4x8xf32>
    %cst_21 = arith.constant dense<0.000000e+00> : vector<64x8xf32>
    %32 = tpu.matmul %29, %31, %cst_21 {dimension_numbers = #tpu.dot_dimension_numbers<[1], [0], [0], [1], [0, 0, 1, 1], [], []>} : vector<64x4xf32>, vector<4x8xf32>, vector<64x8xf32> -> vector<64x8xf32>
    %33 = vector.extract_strided_slice %16 {offsets = [16, 0], sizes = [64, 4], strides = [1, 1]} : vector<96x4xf32> to vector<64x4xf32>
    %c0_22 = arith.constant 0 : index
    %c1_23 = arith.constant 1 : index
    %c0_24 = arith.constant 0 : index
    %c0_25 = arith.constant 0 : index
    %34 = vector.load %arg5[%c0_22, %c1_23, %c0_24, %c0_25] : memref<2x2x4x8xf32, #tpu.memory_space<vmem>>, vector<1x1x4x8xf32>
    %35 = vector.shape_cast %34 : vector<1x1x4x8xf32> to vector<4x8xf32>
    %cst_26 = arith.constant dense<0.000000e+00> : vector<64x8xf32>
    %36 = tpu.matmul %33, %35, %cst_26 {dimension_numbers = #tpu.dot_dimension_numbers<[1], [0], [0], [1], [0, 0, 1, 1], [], []>} : vector<64x4xf32>, vector<4x8xf32>, vector<64x8xf32> -> vector<64x8xf32>
    %37 = arith.addf %32, %36 : vector<64x8xf32>
    %38 = vector.extract_strided_slice %23 {offsets = [0, 0], sizes = [64, 4], strides = [1, 1]} : vector<96x4xf32> to vector<64x4xf32>
    %c0_27 = arith.constant 0 : index
    %c0_28 = arith.constant 0 : index
    %c0_29 = arith.constant 0 : index
    %c0_30 = arith.constant 0 : index
    %39 = vector.load %arg6[%c0_27, %c0_28, %c0_29, %c0_30] : memref<2x2x4x4xf32, #tpu.memory_space<vmem>>, vector<1x1x4x4xf32>
    %40 = vector.shape_cast %39 : vector<1x1x4x4xf32> to vector<4x4xf32>
    %cst_31 = arith.constant dense<0.000000e+00> : vector<64x4xf32>
    %41 = tpu.matmul %38, %40, %cst_31 {dimension_numbers = #tpu.dot_dimension_numbers<[1], [0], [0], [1], [0, 0, 1, 1], [], []>} : vector<64x4xf32>, vector<4x4xf32>, vector<64x4xf32> -> vector<64x4xf32>
    %42 = vector.extract_strided_slice %23 {offsets = [16, 0], sizes = [64, 4], strides = [1, 1]} : vector<96x4xf32> to vector<64x4xf32>
    %c0_32 = arith.constant 0 : index
    %c1_33 = arith.constant 1 : index
    %c0_34 = arith.constant 0 : index
    %c0_35 = arith.constant 0 : index
    %43 = vector.load %arg6[%c0_32, %c1_33, %c0_34, %c0_35] : memref<2x2x4x4xf32, #tpu.memory_space<vmem>>, vector<1x1x4x4xf32>
    %44 = vector.shape_cast %43 : vector<1x1x4x4xf32> to vector<4x4xf32>
    %cst_36 = arith.constant dense<0.000000e+00> : vector<64x4xf32>
    %45 = tpu.matmul %42, %44, %cst_36 {dimension_numbers = #tpu.dot_dimension_numbers<[1], [0], [0], [1], [0, 0, 1, 1], [], []>} : vector<64x4xf32>, vector<4x4xf32>, vector<64x4xf32> -> vector<64x4xf32>
    %46 = arith.addf %41, %45 : vector<64x4xf32>
    %47 = vector.extract_strided_slice %27 {offsets = [0, 0], sizes = [64, 4], strides = [1, 1]} : vector<96x4xf32> to vector<64x4xf32>
    %c0_37 = arith.constant 0 : index
    %c0_38 = arith.constant 0 : index
    %c0_39 = arith.constant 0 : index
    %c0_40 = arith.constant 0 : index
    %48 = vector.load %arg7[%c0_37, %c0_38, %c0_39, %c0_40] : memref<2x2x4x4xf32, #tpu.memory_space<vmem>>, vector<1x1x4x4xf32>
    %49 = vector.shape_cast %48 : vector<1x1x4x4xf32> to vector<4x4xf32>
    %cst_41 = arith.constant dense<0.000000e+00> : vector<64x4xf32>
    %50 = tpu.matmul %47, %49, %cst_41 {dimension_numbers = #tpu.dot_dimension_numbers<[1], [0], [0], [1], [0, 0, 1, 1], [], []>} : vector<64x4xf32>, vector<4x4xf32>, vector<64x4xf32> -> vector<64x4xf32>
    %51 = vector.extract_strided_slice %27 {offsets = [16, 0], sizes = [64, 4], strides = [1, 1]} : vector<96x4xf32> to vector<64x4xf32>
    %c0_42 = arith.constant 0 : index
    %c1_43 = arith.constant 1 : index
    %c0_44 = arith.constant 0 : index
    %c0_45 = arith.constant 0 : index
    %52 = vector.load %arg7[%c0_42, %c1_43, %c0_44, %c0_45] : memref<2x2x4x4xf32, #tpu.memory_space<vmem>>, vector<1x1x4x4xf32>
    %53 = vector.shape_cast %52 : vector<1x1x4x4xf32> to vector<4x4xf32>
    %cst_46 = arith.constant dense<0.000000e+00> : vector<64x4xf32>
    %54 = tpu.matmul %51, %53, %cst_46 {dimension_numbers = #tpu.dot_dimension_numbers<[1], [0], [0], [1], [0, 0, 1, 1], [], []>} : vector<64x4xf32>, vector<4x4xf32>, vector<64x4xf32> -> vector<64x4xf32>
    %55 = arith.addf %50, %54 : vector<64x4xf32>
    %56 = tpu.concatenate %46, %55 in 1 : vector<64x4xf32>, vector<64x4xf32> -> vector<64x8xf32>
    %57 = arith.addf %37, %56 : vector<64x8xf32>
    %58 = vector.broadcast %28 : vector<1x8xf32> to vector<64x8xf32>
    %59 = arith.addf %57, %58 : vector<64x8xf32>
    %60 = vector.shape_cast %59 : vector<64x8xf32> to vector<4x16x8xf32>
    %c0_47 = arith.constant 0 : index
    %c0_48 = arith.constant 0 : index
    %c0_49 = arith.constant 0 : index
    %c0_50 = arith.constant 0 : index
    %c0_51 = arith.constant 0 : index
    %61 = vector.load %arg9[%c0_47, %c0_48, %c0_49, %c0_50, %c0_51] : memref<1x4x2x16x8xf32, #tpu.memory_space<vmem>>, vector<1x4x1x16x8xf32>
    %62 = vector.shape_cast %61 : vector<1x4x1x16x8xf32> to vector<4x16x8xf32>
    %63 = vector.shape_cast %60 : vector<4x16x8xf32> to vector<1x4x1x16x8xf32>
    tpu.vector_store %arg9[%c0_47, %c0_48, %c0_49, %c0_50, %c0_51], %63 {strides = array<i32>} : memref<1x4x2x16x8xf32, #tpu.memory_space<vmem>>, vector<1x4x1x16x8xf32>,
    %64 = vector.extract_strided_slice %16 {offsets = [16, 0], sizes = [64, 4], strides = [1, 1]} : vector<96x4xf32> to vector<64x4xf32>
    %c1_52 = arith.constant 1 : index
    %c0_53 = arith.constant 0 : index
    %c0_54 = arith.constant 0 : index
    %c0_55 = arith.constant 0 : index
    %65 = vector.load %arg5[%c1_52, %c0_53, %c0_54, %c0_55] : memref<2x2x4x8xf32, #tpu.memory_space<vmem>>, vector<1x1x4x8xf32>
    %66 = vector.shape_cast %65 : vector<1x1x4x8xf32> to vector<4x8xf32>
    %cst_56 = arith.constant dense<0.000000e+00> : vector<64x8xf32>
    %67 = tpu.matmul %64, %66, %cst_56 {dimension_numbers = #tpu.dot_dimension_numbers<[1], [0], [0], [1], [0, 0, 1, 1], [], []>} : vector<64x4xf32>, vector<4x8xf32>, vector<64x8xf32> -> vector<64x8xf32>
    %68 = vector.extract_strided_slice %16 {offsets = [32, 0], sizes = [64, 4], strides = [1, 1]} : vector<96x4xf32> to vector<64x4xf32>
    %c1_57 = arith.constant 1 : index
    %c1_58 = arith.constant 1 : index
    %c0_59 = arith.constant 0 : index
    %c0_60 = arith.constant 0 : index
    %69 = vector.load %arg5[%c1_57, %c1_58, %c0_59, %c0_60] : memref<2x2x4x8xf32, #tpu.memory_space<vmem>>, vector<1x1x4x8xf32>
    %70 = vector.shape_cast %69 : vector<1x1x4x8xf32> to vector<4x8xf32>
    %cst_61 = arith.constant dense<0.000000e+00> : vector<64x8xf32>
    %71 = tpu.matmul %68, %70, %cst_61 {dimension_numbers = #tpu.dot_dimension_numbers<[1], [0], [0], [1], [0, 0, 1, 1], [], []>} : vector<64x4xf32>, vector<4x8xf32>, vector<64x8xf32> -> vector<64x8xf32>
    %72 = arith.addf %67, %71 : vector<64x8xf32>
    %73 = vector.extract_strided_slice %23 {offsets = [16, 0], sizes = [64, 4], strides = [1, 1]} : vector<96x4xf32> to vector<64x4xf32>
    %c1_62 = arith.constant 1 : index
    %c0_63 = arith.constant 0 : index
    %c0_64 = arith.constant 0 : index
    %c0_65 = arith.constant 0 : index
    %74 = vector.load %arg6[%c1_62, %c0_63, %c0_64, %c0_65] : memref<2x2x4x4xf32, #tpu.memory_space<vmem>>, vector<1x1x4x4xf32>
    %75 = vector.shape_cast %74 : vector<1x1x4x4xf32> to vector<4x4xf32>
    %cst_66 = arith.constant dense<0.000000e+00> : vector<64x4xf32>
    %76 = tpu.matmul %73, %75, %cst_66 {dimension_numbers = #tpu.dot_dimension_numbers<[1], [0], [0], [1], [0, 0, 1, 1], [], []>} : vector<64x4xf32>, vector<4x4xf32>, vector<64x4xf32> -> vector<64x4xf32>
    %77 = vector.extract_strided_slice %23 {offsets = [32, 0], sizes = [64, 4], strides = [1, 1]} : vector<96x4xf32> to vector<64x4xf32>
    %c1_67 = arith.constant 1 : index
    %c1_68 = arith.constant 1 : index
    %c0_69 = arith.constant 0 : index
    %c0_70 = arith.constant 0 : index
    %78 = vector.load %arg6[%c1_67, %c1_68, %c0_69, %c0_70] : memref<2x2x4x4xf32, #tpu.memory_space<vmem>>, vector<1x1x4x4xf32>
    %79 = vector.shape_cast %78 : vector<1x1x4x4xf32> to vector<4x4xf32>
    %cst_71 = arith.constant dense<0.000000e+00> : vector<64x4xf32>
    %80 = tpu.matmul %77, %79, %cst_71 {dimension_numbers = #tpu.dot_dimension_numbers<[1], [0], [0], [1], [0, 0, 1, 1], [], []>} : vector<64x4xf32>, vector<4x4xf32>, vector<64x4xf32> -> vector<64x4xf32>
    %81 = arith.addf %76, %80 : vector<64x4xf32>
    %82 = vector.extract_strided_slice %27 {offsets = [16, 0], sizes = [64, 4], strides = [1, 1]} : vector<96x4xf32> to vector<64x4xf32>
    %c1_72 = arith.constant 1 : index
    %c0_73 = arith.constant 0 : index
    %c0_74 = arith.constant 0 : index
    %c0_75 = arith.constant 0 : index
    %83 = vector.load %arg7[%c1_72, %c0_73, %c0_74, %c0_75] : memref<2x2x4x4xf32, #tpu.memory_space<vmem>>, vector<1x1x4x4xf32>
    %84 = vector.shape_cast %83 : vector<1x1x4x4xf32> to vector<4x4xf32>
    %cst_76 = arith.constant dense<0.000000e+00> : vector<64x4xf32>
    %85 = tpu.matmul %82, %84, %cst_76 {dimension_numbers = #tpu.dot_dimension_numbers<[1], [0], [0], [1], [0, 0, 1, 1], [], []>} : vector<64x4xf32>, vector<4x4xf32>, vector<64x4xf32> -> vector<64x4xf32>
    %86 = vector.extract_strided_slice %27 {offsets = [32, 0], sizes = [64, 4], strides = [1, 1]} : vector<96x4xf32> to vector<64x4xf32>
    %c1_77 = arith.constant 1 : index
    %c1_78 = arith.constant 1 : index
    %c0_79 = arith.constant 0 : index
    %c0_80 = arith.constant 0 : index
    %87 = vector.load %arg7[%c1_77, %c1_78, %c0_79, %c0_80] : memref<2x2x4x4xf32, #tpu.memory_space<vmem>>, vector<1x1x4x4xf32>
    %88 = vector.shape_cast %87 : vector<1x1x4x4xf32> to vector<4x4xf32>
    %cst_81 = arith.constant dense<0.000000e+00> : vector<64x4xf32>
    %89 = tpu.matmul %86, %88, %cst_81 {dimension_numbers = #tpu.dot_dimension_numbers<[1], [0], [0], [1], [0, 0, 1, 1], [], []>} : vector<64x4xf32>, vector<4x4xf32>, vector<64x4xf32> -> vector<64x4xf32>
    %90 = arith.addf %85, %89 : vector<64x4xf32>
    %91 = tpu.concatenate %81, %90 in 1 : vector<64x4xf32>, vector<64x4xf32> -> vector<64x8xf32>
    %92 = arith.addf %72, %91 : vector<64x8xf32>
    %93 = vector.broadcast %28 : vector<1x8xf32> to vector<64x8xf32>
    %94 = arith.addf %92, %93 : vector<64x8xf32>
    %95 = vector.shape_cast %94 : vector<64x8xf32> to vector<4x16x8xf32>
    %c0_82 = arith.constant 0 : index
    %c0_83 = arith.constant 0 : index
    %c1_84 = arith.constant 1 : index
    %c0_85 = arith.constant 0 : index
    %c0_86 = arith.constant 0 : index
    %96 = vector.load %arg9[%c0_82, %c0_83, %c1_84, %c0_85, %c0_86] : memref<1x4x2x16x8xf32, #tpu.memory_space<vmem>>, vector<1x4x1x16x8xf32>
    %97 = vector.shape_cast %96 : vector<1x4x1x16x8xf32> to vector<4x16x8xf32>
    %98 = vector.shape_cast %95 : vector<4x16x8xf32> to vector<1x4x1x16x8xf32>
    tpu.vector_store %arg9[%c0_82, %c0_83, %c1_84, %c0_85, %c0_86], %98 {strides = array<i32>} : memref<1x4x2x16x8xf32, #tpu.memory_space<vmem>>, vector<1x4x1x16x8xf32>,
    return
  }
  func.func @transform_0(%arg0: i32, %arg1: i32) -> (i32, i32, i32, i32) {
    %c0_i32 = arith.constant 0 : i32
    %c0_i32_0 = arith.constant 0 : i32
    %c0_i32_1 = arith.constant 0 : i32
    return %arg0, %arg1, %c0_i32, %c0_i32_0 : i32, i32, i32, i32
  }
  func.func @transform_1(%arg0: i32, %arg1: i32) -> (i32, i32, i32, i32) {
    %c4_i32 = arith.constant 4 : i32
    %0 = arith.muli %arg1, %c4_i32 : i32
    %c1_i32 = arith.constant 1 : i32
    %1 = arith.subi %0, %c1_i32 : i32
    %c0_i32 = arith.constant 0 : i32
    %2 = arith.maxsi %1, %c0_i32 : i32
    %c0_i32_0 = arith.constant 0 : i32
    %c0_i32_1 = arith.constant 0 : i32
    %c0_i32_2 = arith.constant 0 : i32
    return %arg0, %2, %c0_i32_0, %c0_i32_1 : i32, i32, i32, i32
  }
  func.func @transform_2(%arg0: i32, %arg1: i32) -> (i32, i32, i32, i32) {
    %c1_i32 = arith.constant 1 : i32
    %0 = arith.addi %arg1, %c1_i32 : i32
    %c4_i32 = arith.constant 4 : i32
    %1 = arith.muli %0, %c4_i32 : i32
    %c15_i32 = arith.constant 15 : i32
    %2 = arith.minsi %1, %c15_i32 : i32
    %c0_i32 = arith.constant 0 : i32
    %c0_i32_0 = arith.constant 0 : i32
    %c0_i32_1 = arith.constant 0 : i32
    return %arg0, %2, %c0_i32, %c0_i32_0 : i32, i32, i32, i32
  }
  func.func @transform_3(%arg0: i32, %arg1: i32) -> (i32, i32, i32, i32) {
    %c0_i32 = arith.constant 0 : i32
    %c0_i32_0 = arith.constant 0 : i32
    %c0_i32_1 = arith.constant 0 : i32
    %c0_i32_2 = arith.constant 0 : i32
    %c0_i32_3 = arith.constant 0 : i32
    return %c0_i32, %c0_i32_0, %c0_i32_1, %c0_i32_2 : i32, i32, i32, i32
  }
  func.func @transform_4(%arg0: i32, %arg1: i32) -> (i32, i32, i32, i32) {
    %c0_i32 = arith.constant 0 : i32
    %c0_i32_0 = arith.constant 0 : i32
    %c0_i32_1 = arith.constant 0 : i32
    %c0_i32_2 = arith.constant 0 : i32
    %c0_i32_3 = arith.constant 0 : i32
    return %c0_i32, %c0_i32_0, %c0_i32_1, %c0_i32_2 : i32, i32, i32, i32
  }
  func.func @transform_5(%arg0: i32, %arg1: i32) -> (i32, i32, i32, i32) {
    %c0_i32 = arith.constant 0 : i32
    %c0_i32_0 = arith.constant 0 : i32
    %c0_i32_1 = arith.constant 0 : i32
    %c0_i32_2 = arith.constant 0 : i32
    %c0_i32_3 = arith.constant 0 : i32
    return %c0_i32, %c0_i32_0, %c0_i32_1, %c0_i32_2 : i32, i32, i32, i32
  }
  func.func @transform_6(%arg0: i32, %arg1: i32) -> (i32, i32) {
    %c0_i32 = arith.constant 0 : i32
    %c0_i32_0 = arith.constant 0 : i32
    %c0_i32_1 = arith.constant 0 : i32
    return %c0_i32, %c0_i32_0 : i32, i32
  }
  func.func @transform_7(%arg0: i32, %arg1: i32) -> (i32, i32, i32, i32, i32) {
    %c0_i32 = arith.constant 0 : i32
    %c0_i32_0 = arith.constant 0 : i32
    %c0_i32_1 = arith.constant 0 : i32
    %c0_i32_2 = arith.constant 0 : i32
    return %arg0, %arg1, %c0_i32, %c0_i32_0, %c0_i32_1 : i32, i32, i32, i32, i32
  }
}

</mosaic_0001>

<bundles_post_ra>
// kernel: upsample_forward.1
= control target key start
LH: loop header
LB: loop body
LE: loop exit
PB: predicated region body
PF: predicated region fallthrough
CT: control target
= control target key end

     0   :  { %s1823_s24 = smov 0   ;;  %s1825_s25 = smov 0   ;;  %s2478_s0 = inlined_call_operand.vmem [shape: f32[2,16,16,4], index: 0, kind: input, shape index: {}, may-alias: {0,1,2}]   ;;  %s2479_s1 = inlined_call_operand.vmem [shape: f32[2,16,16,4], index: 1, kind: input, shape index: {}, may-alias: {0,1,2}]   ;;  %s2480_s2 = inlined_call_operand.vmem [shape: f32[2,16,16,4], index: 2, kind: input, shape index: {}, may-alias: {0,1,2}]   ;;  %s2481_s3 = inlined_call_operand.vmem [shape: f32[2,2,4,8], index: 3, kind: input, shape index: {}]   ;;  %s2482_s4 = inlined_call_operand.vmem [shape: f32[2,2,4,4], index: 4, kind: input, shape index: {}]   ;;  %s2483_s5 = inlined_call_operand.vmem [shape: f32[2,2,4,4], index: 5, kind: input, shape index: {}]   ;;  %s2484_s6 = inlined_call_operand.vmem [shape: f32[1,8], index: 6, kind: input, shape index: {}]   ;;  %s2485_s7 = inlined_call_operand.vmem [shape: f32[2,16,2,16,8], index: 7, kind: output, shape index: {}]  }
   0x1   :  { %s1827_s26 = smov 0   ;;  %s1829_s27 = smov 0  }
   0x2   :  { %s1831_s28 = smov 0  }
   0x3 LB: > { %s26_s29 = sadd.s32 1, %s1770_s26  ;;  %s29_s30 = sadd.s32 1, %s1774_s27  ;;  %s1778_s28 = sphi %s1831_s28, %s17_s28   ;;  %s1774_s27 = sphi %s1829_s27, %s2491_s27   ;;  %s1770_s26 = sphi %s1827_s26, %s2490_s26   ;;  %s1766_s25 = sphi %s1825_s25, %s2489_s25   ;;  %s1762_s24 = sphi %s1823_s24, %s2488_s24  }
   0x4   : > { %p27_p0 = scmp.ge.s32.totalorder %s26_s29, 4  ;;  %p1531_p1 = scmp.ge.s32.totalorder %s1778_s28, 1 }
   0x5   : > { %p323_p2 = scmp.lt.s32.totalorder %s1778_s28, 9 }
   0x6   : > { %s2493_s29 = smov (%p27_p0, %s26_s29), 0  ;;  %s2495_s30 = smov (!%p27_p0, %s29_s30), %s1774_s27 }
   0x7   : > { %p324_p3 = pnand %p1531_p1, %p323_p2  ;;  %p31_p4 = scmp.ge.s32.totalorder %s2495_s30, 2 }
   0x8   : > { %s1532_s8 = sshll.u32 (!%p324_p3), %s1762_s24, 2  ;;  %p392_p5 = scmp.lt.s32.totalorder (!%p324_p3), %s1766_s25, 1 }
   0x9   : > { %s2497_s30 = smov (%p31_p4, %s2495_s30), 0  ;;  %327 = sbr.rel (%p324_p3) target bundleno = 516 (0x204), region = 48 }
   0xa   : > { %p394_p6 = scmp.lt.s32.totalorder (!%p324_p3), %s1532_s8, 15  ;;  %s1537_s9 = sadd.s32 (!%p324_p3), 4294967295, %s1532_s8 }
   0xb   : > { %p404_p7 = scmp.gt.s32.totalorder (!%p324_p3), %s1537_s9, 0  ;;  %p1538_p8 = scmp.lt.s32.totalorder (!%p324_p3), %s1537_s9, 15 }
   0xc   : > { %s1695_s14 = sadd.s32 (!%p324_p3), 4, %s1532_s8  ;;  %p1557_p10 = scmp.ne.s32.totalorder (!%p324_p3), %s1762_s24, 0 }
   0xd   : > { %p1865_p9 = scmp.lt.s32.totalorder (!%p324_p3), %s1695_s14, 15 }
   0xe   : > { %s2499_s25 = smov (!%p392_p5, %s1766_s25), 1  ;;  %vm456_vm0 = vcmask 31744  }
   0xf   : > { %s1858_s10 = scalar_select %p394_p6, %s1532_s8, 15 }
  0x10   : > { %s1861_s11 = sshll.u32 %s2499_s25, 5  ;;  %s2501_s14 = smov (!%p1865_p9, %s1695_s14), 15 }
  0x11   : > { %s1533_s12 = sshll.u32 %s1858_s10, 1  ;;  %s2505_s14 = smov (!%p1865_p9, %s2501_s14), 15 }
  0x12   : > { %s398_s13 = sadd.s32 %s1861_s11, %s1533_s12  ;;  %s1555_s23 = sshll.u32 %s2499_s25, 6 }
  0x13   : > { %s1535_s15 = sshll.u32 %s398_s13, 3  ;;  %s1550_s12 = sshll.u32 %s2505_s14, 1 }
  0x14   : > { %s400_s19 = scalar_lea.vmem %s2478_s0, %s1535_s15  ;;  %s429_s13 = sadd.s32 %s1550_s12, %s1861_s11 }
  0x15   : > { %s405_s21 = scalar_select %p404_p7, %s1537_s9, 0  ;;  %v447_v0 = vld [vmem:[%s400_s19] sm:$0xff]  ;;  %v448_v1 = vld [vmem:[%s400_s19 + $0x8] sm:$0xff]  ;;  %v449_v2 = vld [vmem:[%s400_s19 + $0x10] sm:$0xff] }
  0x16   : > { %457 = vst.msk [vmem:[#allocation2 + $0x10] sm:$0xff] %vm456_vm0, %v447_v0  ;;  %v450_v3 = vld [vmem:[%s400_s19 + $0x18] sm:$0xff]  ;;  %v451_v4 = vld [vmem:[%s400_s19 + $0x20] sm:$0xff]  ;;  %v452_v5 = vld [vmem:[%s400_s19 + $0x28] sm:$0xff]  ;;  %s1552_s18 = sshll.u32 %s429_s13, 3 }
  0x17   : > { %s2503_s21 = smov (!%p1538_p8, %s405_s21), 15  ;;  %458 = vst.msk [vmem:[#allocation2 + $0x18] sm:$0xff] %vm456_vm0, %v448_v1  ;;  %v453_v6 = vld [vmem:[%s400_s19 + $0x30] sm:$0xff]  ;;  %v454_v7 = vld [vmem:[%s400_s19 + $0x38] sm:$0xff]  ;;  %s431_s20 = scalar_lea.vmem %s2480_s2, %s1552_s18 }
  0x18   : > { %459 = vst.msk [vmem:[#allocation2 + $0x20] sm:$0xff] %vm456_vm0, %v449_v2  ;;  %s1543_s22 = sshll.u32 %s2503_s21, 1 }
  0x19   : > { %460 = vst.msk [vmem:[#allocation2 + $0x28] sm:$0xff] %vm456_vm0, %v450_v3  ;;  %s412_s8 = sadd.s32 %s1543_s22, %s1861_s11  ;;  %s2487_s22 = sshll.u32 %s1858_s10, 2 }
  0x1a   : > { %461 = vst.msk [vmem:[#allocation2 + $0x30] sm:$0xff] %vm456_vm0, %v451_v4  ;;  %s1545_s9 = sshll.u32 %s412_s8, 3  ;;  %s443_s14 = sadd.s32 %s1555_s23, %s2487_s22 }
  0x1b   : > { %462 = vst.msk [vmem:[#allocation2 + $0x38] sm:$0xff] %vm456_vm0, %v452_v5  ;;  %s414_s17 = scalar_lea.vmem %s2479_s1, %s1545_s9  ;;  %s1556_s19 = sshll.u32 %s443_s14, 3 }
  0x1c   : > { %463 = vst.msk [vmem:[#allocation2 + $0x40] sm:$0xff] %vm456_vm0, %v453_v6  ;;  %s1900_s12 = scalar_lea.vmem %s2485_s7, %s1556_s19  ;;  %468 = sbr.rel (%p1557_p10) target bundleno = 36 (0x24), region = 52 }
  0x1d   : > { %464 = vst.msk [vmem:[#allocation2 + $0x48] sm:$0xff] %vm456_vm0, %v454_v7 }
  0x21   : > { %v1780_v8 = vmov 0.0  }
  0x22   : > { %469 = vst.msk [vmem:[#allocation2] sm:$0xff] %vm456_vm0, %v1780_v8 }
  0x23   : > { %470 = vst.msk [vmem:[#allocation2 + $0x8] sm:$0xff] %vm456_vm0, %v1780_v8 }
  0x24 PF: > { %p1558_p11 = scmp.le.s32.totalorder %s1762_s24, 0 }
  0x26   : > { %474 = sbr.rel (%p1558_p11) target bundleno = 46 (0x2e), region = 56 }
  0x2b   : > { %v475_v9 = vld [vmem:[%s414_s17] sm:$0xff]  ;;  %v476_v10 = vld [vmem:[%s414_s17 + $0x8] sm:$0xff] }
  0x2c   : > { %477 = vst.msk [vmem:[#allocation2] sm:$0xff] %vm456_vm0, %v475_v9 }
  0x2d   : > { %478 = vst.msk [vmem:[#allocation2 + $0x8] sm:$0xff] %vm456_vm0, %v476_v10 }
  0x2e PF: > { %p1559_p12 = scmp.ne.s32.totalorder %s1762_s24, 3 }
  0x30   : > { %482 = sbr.rel (%p1559_p12) target bundleno = 56 (0x38), region = 60 }
  0x35   : > { %v1781_v11 = vmov 0.0  }
  0x36   : > { %484 = vst.msk [vmem:[#allocation2 + $0x50] sm:$0xff] %vm456_vm0, %v1781_v11 }
  0x37   : > { %485 = vst.msk [vmem:[#allocation2 + $0x58] sm:$0xff] %vm456_vm0, %v1781_v11 }
  0x38 PF: > { %p1560_p13 = scmp.ge.s32.totalorder %s1762_s24, 3 }
  0x3a   : > { %489 = sbr.rel (%p1560_p13) target bundleno = 66 (0x42), region = 64 }
  0x3f   : > { %v490_v12 = vld [vmem:[%s431_s20] sm:$0xff]  ;;  %v491_v13 = vld [vmem:[%s431_s20 + $0x8] sm:$0xff] }
  0x40   : > { %493 = vst.msk [vmem:[#allocation2 + $0x50] sm:$0xff] %vm456_vm0, %v490_v12 }
  0x41   : > { %494 = vst.msk [vmem:[#allocation2 + $0x58] sm:$0xff] %vm456_vm0, %v491_v13 }
  0x42 PF: > { %v1561_v14 = vld [vmem:[%s2481_s3 + $0x4] sm:$0xf]  ;;  %vm616_vm1 = vcmask 1043456   ;;  %v589_v15 = vld [vmem:[%s2481_s3] sm:$0xf]  ;;  %v1920_v16 = vld [vmem:[#allocation2 + $0x10] sm:$0xff]  ;;  %v507_v17 = vlaneseq }
  0x43   : > { %1562 = vmatpush.msk.msra.mxu0 %vm616_vm1, %v1561_v14  ;;  %1571 = vmatpush.msk.msra.mxu1 %vm616_vm1, %v589_v15  ;;  %v1924_v18 = vld [vmem:[#allocation2] sm:$0xff]  ;;  %v514_v21 = vrot.slane %v1920_v16, 7  ;;  %v1938_v23 = vld [vmem:[#allocation2 + $0x8] sm:$0xff]  ;;  %v1973_v34 = vld [vmem:[#allocation2 + $0x18] sm:$0xff]  ;;  %v553_v63 = vrot.slane %v1920_v16, 1  ;;  %s1782_s16 = smov 4  }
  0x44   : > { %v1580_v19 = vld [vmem:[%s2482_s4 + $0x4] sm:$0xf]  ;;  %v711_v20 = vld [vmem:[%s2482_s4] sm:$0xf]  ;;  %1563 = vmatmul.msk.f32.vlgmr.msra.gmra.mxu0 %vm456_vm0, %v1920_v16  ;;  %v512_v22 = vrot.slane %v1924_v18, 7  ;;  %1572 = vmatmul.msk.f32.vlgmr.msra.gmra.mxu1 %vm456_vm0, %v1924_v18  ;;  %v1940_v24 = vshrl.u32 %v507_v17, 7 }
  0x45   : > { %1581 = vmatpush.msk.msra.mxu2 %vm616_vm1, %v1580_v19  ;;  %1590 = vmatpush.msk.msra.mxu3 %vm616_vm1, %v711_v20  ;;  %v513_v26 = vrot.slane %v1938_v23, 7  ;;  %v1619_v28 = vld [vmem:[%s2481_s3 + $0xc] sm:$0xf]  ;;  %v1618_v29 = vld [vmem:[%s2481_s3 + $0x8] sm:$0xf]  ;;  %v515_v35 = vrot.slane %v1973_v34, 7 }
  0x46   : > { %vm510_vm2 = vcmp.eq.s32.totalorder %v1940_v24, 0  ;;  %vm524_vm3 = vcmp.lt.s32.totalorder %v1940_v24, 1  ;;  %v1980_v36 = vld [vmem:[#allocation2 + $0x20] sm:$0xff]  ;;  %v2006_v42 = vld [vmem:[#allocation2 + $0x28] sm:$0xff]  ;;  %v2013_v44 = vld [vmem:[#allocation2 + $0x30] sm:$0xff]  ;;  %v551_v62 = vrot.slane %v1924_v18, 1 }
  0x47   : > { %1620 = vmatpush.msk.msrb.mxu2 %vm616_vm1, %v1619_v28  ;;  %1629 = vmatpush.msk.msrb.mxu3 %vm616_vm1, %v1618_v29  ;;  %v534_v30 = vsel %vm524_vm3, %v513_v26, %v514_v21  ;;  %v1984_v37 = vsel %vm524_vm3, %v514_v21, %v515_v35  ;;  %v535_v38 = vsel %vm524_vm3, %v512_v22, %v513_v26  ;;  %v516_v39 = vrot.slane %v1980_v36, 7  ;;  %v1599_v45 = vld [vmem:[%s2483_s5 + $0x4] sm:$0xf]  ;;  %v832_v46 = vld [vmem:[%s2483_s5] sm:$0xf]  ;;  %v2046_v51 = vld [vmem:[#allocation2 + $0x38] sm:$0xff] }
  0x48   : > { %v1942_v25 = vld [vmem:[#allocation2 + $0x58] sm:$0xff]  ;;  %v1966_v32 = vsel %vm510_vm2, 0.0, %v534_v30  ;;  %v517_v43 = vrot.slane %v2006_v42, 7  ;;  %1600 = vmatpush.msk.msrb.mxu0 %vm616_vm1, %v1599_v45  ;;  %1609 = vmatpush.msk.msrb.mxu1 %vm616_vm1, %v832_v46  ;;  %v518_v48 = vrot.slane %v2013_v44, 7  ;;  %v1659_v52 = vld [vmem:[%s2483_s5 + $0xc] sm:$0xf] }
  0x49   : > { %v523_v27 = vrot.slane %v1942_v25, 7  ;;  %1582 = vmatmul.msk.f32.vlgmr.msra.gmra.mxu2 %vm456_vm0, %v1966_v32  ;;  %v532_v40 = vsel %vm524_vm3, %v515_v35, %v516_v39  ;;  %v1658_v53 = vld [vmem:[%s2483_s5 + $0x8] sm:$0xf]  ;;  %v519_v54 = vrot.slane %v2046_v51, 7  ;;  %v2061_v55 = vld [vmem:[#allocation2 + $0x40] sm:$0xff]  ;;  %v554_v0 = vrot.slane %v1973_v34, 1 }
  0x4a   : > { %v2000_v41 = vsel %vm510_vm2, 0.0, %v532_v40  ;;  %v2025_v47 = vsel %vm524_vm3, %v516_v39, %v517_v43  ;;  %v530_v49 = vsel %vm524_vm3, %v517_v43, %v518_v48  ;;  %1660 = vmatpush.msk.msra.mxu2 %vm616_vm1, %v1659_v52  ;;  %v520_v57 = vrot.slane %v2061_v55, 7  ;;  %v2086_v60 = vld [vmem:[#allocation2 + $0x48] sm:$0xff] }
  0x4b   : > { %v536_v31 = vsel %vm524_vm3, %v523_v27, %v512_v22  ;;  %v2040_v50 = vsel %vm510_vm2, 0.0, %v530_v49  ;;  %v2065_v56 = vsel %vm524_vm3, %v518_v48, %v519_v54  ;;  %v521_v61 = vrot.slane %v2086_v60, 7 }
  0x4c   : > { %v537_v33 = vsel %vm510_vm2, 0.0, %v536_v31  ;;  %1564 = vmatmul.msk.f32.gmra.mxu0 %vm456_vm0, %v1973_v34  ;;  %1573 = vmatmul.msk.f32.gmra.mxu1 %vm456_vm0, %v1938_v23  ;;  %v528_v58 = vsel %vm524_vm3, %v519_v54, %v520_v57  ;;  %v552_v1 = vrot.slane %v1938_v23, 1  ;;  %vm563_vm4 = vcmp.lt.s32.totalorder %v1940_v24, 7  ;;  %v2186_v23 = vld [vmem:[#allocation2 + $0x50] sm:$0xff] }
  0x4d   : > { %1591 = vmatmul.msk.f32.vlgmr.msra.gmra.mxu3 %vm456_vm0, %v537_v33  ;;  %v2080_v59 = vsel %vm510_vm2, 0.0, %v528_v58  ;;  %v2102_v2 = vsel %vm524_vm3, %v520_v57, %v521_v61  ;;  %v2110_v3 = vsel %vm563_vm4, %v553_v63, %v554_v0  ;;  %v2117_v5 = vadd.s32 8, %v1940_v24 }
  0x4e   : > { %1669 = vmatpush.msk.msra.mxu3 %vm616_vm1, %v1658_v53  ;;  %v574_v4 = vsel %vm563_vm4, %v551_v62, %v552_v1  ;;  %v555_v6 = vrot.slane %v1980_v36, 1  ;;  %v573_v8 = vsel %vm563_vm4, %v552_v1, %v553_v63  ;;  %v556_v11 = vrot.slane %v2006_v42, 1  ;;  %v1639_v1 = vld [vmem:[%s2482_s4 + $0xc] sm:$0xf] }
  0x4f   : > { %vm550_vm5 = vcmp.eq.s32.totalorder %v2117_v5, 15  ;;  %v557_v13 = vrot.slane %v2013_v44, 1  ;;  %v559_v19 = vrot.slane %v2061_v55, 1  ;;  %v560_v22 = vrot.slane %v2086_v60, 1  ;;  %1640 = vmatpush.msk.msra.mxu0 %vm616_vm1, %v1639_v1 }
  0x50   : > { %v571_v7 = vsel %vm563_vm4, %v554_v0, %v555_v6  ;;  %v577_v10 = vsel %vm550_vm5, 0.0, %v573_v8  ;;  %v570_v12 = vsel %vm563_vm4, %v555_v6, %v556_v11  ;;  %v561_v28 = vrot.slane %v2186_v23, 1 }
  0x51   : > { %1583 = vmatmul.msk.f32.gmra.mxu2 %vm456_vm0, %v1984_v37  ;;  %v579_v9 = vsel %vm550_vm5, 0.0, %v571_v7  ;;  %v569_v14 = vsel %vm563_vm4, %v556_v11, %v557_v13  ;;  %v2194_v26 = vsel %vm563_vm4, %v559_v19, %v560_v22  ;;  %vm1012_vm6 = vcmask 64512  }
  0x52   : > { %v581_v15 = vsel %vm550_vm5, 0.0, %v569_v14  ;;  %v565_v29 = vsel %vm563_vm4, %v560_v22, %v561_v28 }
  0x53   : > { %v2211_v30 = vsel %vm550_vm5, 0.0, %v565_v29 }
  0x54   : > { %1565 = vmatmul.msk.f32.gmra.mxu0 %vm456_vm0, %v1980_v36  ;;  %1574 = vmatmul.msk.f32.gmra.mxu1 %vm456_vm0, %v1920_v16 }
  0x55   : > { %1592 = vmatmul.msk.f32.gmra.mxu3 %vm456_vm0, %v535_v38 }
  0x59   : > { %1584 = vmatmul.msk.f32.gmra.mxu2 %vm456_vm0, %v2000_v41 }
  0x5c   : > { %1566 = vmatmul.msk.f32.gmra.mxu0 %vm456_vm0, %v2006_v42  ;;  %1575 = vmatmul.msk.f32.gmra.mxu1 %vm456_vm0, %v1973_v34 }
  0x5d   : > { %1593 = vmatmul.msk.f32.gmra.mxu3 %vm456_vm0, %v1966_v32 }
  0x61   : > { %1585 = vmatmul.msk.f32.gmra.mxu2 %vm456_vm0, %v2025_v47 }
  0x64   : > { %1567 = vmatmul.msk.f32.gmra.mxu0 %vm456_vm0, %v2013_v44  ;;  %1576 = vmatmul.msk.f32.gmra.mxu1 %vm456_vm0, %v1980_v36 }
  0x65   : > { %1594 = vmatmul.msk.f32.gmra.mxu3 %vm456_vm0, %v1984_v37 }
  0x69   : > { %1586 = vmatmul.msk.f32.gmra.mxu2 %vm456_vm0, %v2040_v50 }
  0x6c   : > { %1568 = vmatmul.msk.f32.gmra.mxu0 %vm456_vm0, %v2046_v51  ;;  %1577 = vmatmul.msk.f32.gmra.mxu1 %vm456_vm0, %v2006_v42 }
  0x6d   : > { %1595 = vmatmul.msk.f32.gmra.mxu3 %vm456_vm0, %v2000_v41 }
  0x71   : > { %1587 = vmatmul.msk.f32.gmra.mxu2 %vm456_vm0, %v2065_v56 }
  0x74   : > { %1569 = vmatmul.msk.f32.gmra.mxu0 %vm456_vm0, %v2061_v55  ;;  %1578 = vmatmul.msk.f32.gmra.mxu1 %vm456_vm0, %v2013_v44 }
  0x75   : > { %1596 = vmatmul.msk.f32.gmra.mxu3 %vm456_vm0, %v2025_v47 }
  0x79   : > { %1588 = vmatmul.msk.f32.gmra.mxu2 %vm456_vm0, %v2080_v59 }
  0x7c   : > { %1570 = vmatmul.msk.f32.gmra.mxu0 %vm456_vm0, %v2086_v60  ;;  %1579 = vmatmul.msk.f32.gmra.mxu1 %vm456_vm0, %v2046_v51 }
  0x7d   : > { %1597 = vmatmul.msk.f32.gmra.mxu3 %vm456_vm0, %v2040_v50 }
  0x81   : > { %1589 = vmatmul.msk.f32.gmra.mxu2 %vm456_vm0, %v2102_v2 }
  0x84   : > { %1601 = vmatmul.msk.f32.vlgmr.msrb.gmra.mxu0 %vm456_vm0, %v2110_v3  ;;  %1610 = vmatmul.msk.f32.vlgmr.msrb.gmra.mxu1 %vm456_vm0, %v574_v4 }
  0x85   : > { %1598 = vmatmul.msk.f32.gmra.mxu3 %vm456_vm0, %v2065_v56 }
  0x89   : > { %1621 = vmatmul.msk.f32.vlgmr.msrb.gmra.mxu2 %vm456_vm0, %v1980_v36 }
  0x8c   : > { %1602 = vmatmul.msk.f32.gmra.mxu0 %vm456_vm0, %v579_v9  ;;  %1611 = vmatmul.msk.f32.gmra.mxu1 %vm456_vm0, %v577_v10 }
  0x8d   : > { %1630 = vmatmul.msk.f32.vlgmr.msrb.gmra.mxu3 %vm456_vm0, %v1920_v16  ;;  %v558_v16 = vrot.slane %v2046_v51, 1 }
  0x8f   : > { %v2166_v17 = vsel %vm563_vm4, %v557_v13, %v558_v16  ;;  %v567_v20 = vsel %vm563_vm4, %v558_v16, %v559_v19  ;;  %v562_v16 = vrot.slane %v1942_v25, 1 }
  0x90   : > { %v2180_v21 = vsel %vm550_vm5, 0.0, %v567_v20 }
  0x91   : > { %1622 = vmatmul.msk.f32.gmra.mxu2 %vm456_vm0, %v2006_v42  ;;  %v564_v20 = vsel %vm563_vm4, %v561_v28, %v562_v16 }
  0x94   : > { %1603 = vmatmul.msk.f32.gmra.mxu0 %vm456_vm0, %v570_v12  ;;  %1612 = vmatmul.msk.f32.gmra.mxu1 %vm456_vm0, %v2110_v3 }
  0x95   : > { %1631 = vmatmul.msk.f32.gmra.mxu3 %vm456_vm0, %v1973_v34 }
  0x99   : > { %1623 = vmatmul.msk.f32.gmra.mxu2 %vm456_vm0, %v2013_v44 }
  0x9c   : > { %1604 = vmatmul.msk.f32.gmra.mxu0 %vm456_vm0, %v581_v15  ;;  %1613 = vmatmul.msk.f32.gmra.mxu1 %vm456_vm0, %v579_v9 }
  0x9d   : > { %1632 = vmatmul.msk.f32.gmra.mxu3 %vm456_vm0, %v1980_v36 }
  0xa1   : > { %1624 = vmatmul.msk.f32.gmra.mxu2 %vm456_vm0, %v2046_v51 }
  0xa4   : > { %1605 = vmatmul.msk.f32.gmra.mxu0 %vm456_vm0, %v2166_v17  ;;  %1614 = vmatmul.msk.f32.gmra.mxu1 %vm456_vm0, %v570_v12 }
  0xa5   : > { %1633 = vmatmul.msk.f32.gmra.mxu3 %vm456_vm0, %v2006_v42 }
  0xa9   : > { %1625 = vmatmul.msk.f32.gmra.mxu2 %vm456_vm0, %v2061_v55 }
  0xac   : > { %1606 = vmatmul.msk.f32.gmra.mxu0 %vm456_vm0, %v2180_v21  ;;  %1615 = vmatmul.msk.f32.gmra.mxu1 %vm456_vm0, %v581_v15 }
  0xad   : > { %1634 = vmatmul.msk.f32.gmra.mxu3 %vm456_vm0, %v2013_v44 }
  0xb1   : > { %1626 = vmatmul.msk.f32.gmra.mxu2 %vm456_vm0, %v2086_v60 }
  0xb4   : > { %1607 = vmatmul.msk.f32.gmra.mxu0 %vm456_vm0, %v2194_v26  ;;  %1616 = vmatmul.msk.f32.gmra.mxu1 %vm456_vm0, %v2166_v17 }
  0xb5   : > { %1635 = vmatmul.msk.f32.gmra.mxu3 %vm456_vm0, %v2046_v51 }
  0xb9   : > { %1627 = vmatmul.msk.f32.gmra.mxu2 %vm456_vm0, %v2186_v23 }
  0xbc   : > { %1608 = vmatmul.msk.f32.gmra.mxu0 %vm456_vm0, %v2211_v30  ;;  %1617 = vmatmul.msk.f32.gmra.mxu1 %vm456_vm0, %v2180_v21 }
  0xbd   : > { %1636 = vmatmul.msk.f32.gmra.mxu3 %vm456_vm0, %v2061_v55 }
  0xc1   : > { %v637_v31 = vpop.f32.mrf.mxu0  ;;  %v687_v33 = vpop.f32.mrf.mxu1  ;;  %1628 = vmatmul.msk.f32.gmra.mxu2 %vm456_vm0, %v1942_v25 }
  0xc2   : > { %v2221_v34 = vadd.f32 %v687_v33, %v637_v31 }
  0xc4   : > { %1641 = vmatmul.msk.f32.vlgmr.msra.gmra.mxu0 %vm456_vm0, %v2000_v41 }
  0xc5   : > { %1637 = vmatmul.msk.f32.gmra.mxu3 %vm456_vm0, %v2086_v60 }
  0xc9   : > { %v640_v35 = vpop.f32.mrf.mxu0  ;;  %v690_v36 = vpop.f32.mrf.mxu1  ;;  %1661 = vmatmul.msk.f32.vlgmr.msra.gmra.mxu2 %vm456_vm0, %v570_v12 }
  0xca   : > { %v2226_v38 = vadd.f32 %v690_v36, %v640_v35 }
  0xcc   : > { %v758_v39 = vpop.f32.mrf.mxu2  ;;  %1642 = vmatmul.msk.f32.gmra.mxu0 %vm456_vm0, %v2025_v47 }
  0xcd   : > { %1670 = vmatmul.msk.f32.vlgmr.msra.gmra.mxu3 %vm456_vm0, %v2110_v3  ;;  %v1638_v3 = vld [vmem:[%s2482_s4 + $0x8] sm:$0xf] }
  0xce   : > { %1649 = vmatpush.msk.msra.mxu1 %vm616_vm1, %v1638_v3 }
  0xcf   : > { %1650 = vmatmul.msk.f32.vlgmr.msra.gmra.mxu1 %vm456_vm0, %v1966_v32 }
  0xd0   : > { %v808_v40 = vpop.f32.mrf.mxu3 }
  0xd1   : > { %v2228_v42 = vadd.f32 %v808_v40, %v758_v39  ;;  %v643_v43 = vpop.f32.mrf.mxu0  ;;  %v693_v44 = vpop.f32.mrf.mxu1  ;;  %1662 = vmatmul.msk.f32.gmra.mxu2 %vm456_vm0, %v581_v15 }
  0xd2   : > { %v2232_v45 = vadd.f32 %v693_v44, %v643_v43 }
  0xd4   : > { %v761_v46 = vpop.f32.mrf.mxu2  ;;  %1643 = vmatmul.msk.f32.gmra.mxu0 %vm456_vm0, %v2040_v50 }
  0xd5   : > { %1671 = vmatmul.msk.f32.gmra.mxu3 %vm456_vm0, %v579_v9 }
  0xd7   : > { %1651 = vmatmul.msk.f32.gmra.mxu1 %vm456_vm0, %v1984_v37 }
  0xd8   : > { %v811_v48 = vpop.f32.mrf.mxu3 }
  0xd9   : > { %v2234_v49 = vadd.f32 %v811_v48, %v761_v46  ;;  %v646_v51 = vpop.f32.mrf.mxu0  ;;  %v696_v52 = vpop.f32.mrf.mxu1  ;;  %1663 = vmatmul.msk.f32.gmra.mxu2 %vm456_vm0, %v2166_v17 }
  0xda   : > { %v2239_v53 = vadd.f32 %v696_v52, %v646_v51 }
  0xdc   : > { %v764_v54 = vpop.f32.mrf.mxu2  ;;  %1644 = vmatmul.msk.f32.gmra.mxu0 %vm456_vm0, %v2065_v56 }
  0xdd   : > { %1672 = vmatmul.msk.f32.gmra.mxu3 %vm456_vm0, %v570_v12 }
  0xdf   : > { %1652 = vmatmul.msk.f32.gmra.mxu1 %vm456_vm0, %v2000_v41  ;;  %v575_v41 = vsel %vm563_vm4, %v562_v16, %v551_v62 }
  0xe0   : > { %v814_v55 = vpop.f32.mrf.mxu3 }
  0xe1   : > { %v2241_v57 = vadd.f32 %v814_v55, %v764_v54  ;;  %v649_v58 = vpop.f32.mrf.mxu0  ;;  %v699_v63 = vpop.f32.mrf.mxu1  ;;  %1664 = vmatmul.msk.f32.gmra.mxu2 %vm456_vm0, %v2180_v21 }
  0xe2   : > { %v2246_v0 = vadd.f32 %v699_v63, %v649_v58 }
  0xe4   : > { %v767_v4 = vpop.f32.mrf.mxu2  ;;  %1645 = vmatmul.msk.f32.gmra.mxu0 %vm456_vm0, %v2080_v59 }
  0xe5   : > { %1673 = vmatmul.msk.f32.gmra.mxu3 %vm456_vm0, %v581_v15 }
  0xe7   : > { %1653 = vmatmul.msk.f32.gmra.mxu1 %vm456_vm0, %v2025_v47 }
  0xe8   : > { %v817_v6 = vpop.f32.mrf.mxu3 }
  0xe9   : > { %v2260_v7 = vadd.f32 %v817_v6, %v767_v4  ;;  %v652_v8 = vpop.f32.mrf.mxu0  ;;  %v702_v9 = vpop.f32.mrf.mxu1  ;;  %1665 = vmatmul.msk.f32.gmra.mxu2 %vm456_vm0, %v2194_v26 }
  0xea   : > { %v2266_v10 = vadd.f32 %v702_v9, %v652_v8 }
  0xec   : > { %v770_v11 = vpop.f32.mrf.mxu2  ;;  %1646 = vmatmul.msk.f32.gmra.mxu0 %vm456_vm0, %v2102_v2 }
  0xed   : > { %1674 = vmatmul.msk.f32.gmra.mxu3 %vm456_vm0, %v2166_v17 }
  0xef   : > { %1654 = vmatmul.msk.f32.gmra.mxu1 %vm456_vm0, %v2040_v50 }
  0xf0   : > { %v820_v12 = vpop.f32.mrf.mxu3 }
  0xf1   : > { %v2272_v32 = vadd.f32 %v820_v12, %v770_v11  ;;  %v655_v13 = vpop.f32.mrf.mxu0  ;;  %v705_v14 = vpop.f32.mrf.mxu1  ;;  %1666 = vmatmul.msk.f32.gmra.mxu2 %vm456_vm0, %v2211_v30 }
  0xf2   : > { %v2278_v15 = vadd.f32 %v705_v14, %v655_v13 }
  0xf4   : > { %v773_v17 = vpop.f32.mrf.mxu2 }
  0xf5   : > { %1675 = vmatmul.msk.f32.gmra.mxu3 %vm456_vm0, %v2180_v21 }
  0xf7   : > { %1655 = vmatmul.msk.f32.gmra.mxu1 %vm456_vm0, %v2065_v56 }
  0xf8   : > { %v823_v19 = vpop.f32.mrf.mxu3 }
  0xf9   : > { %v2285_v37 = vadd.f32 %v823_v19, %v773_v17  ;;  %v658_v21 = vpop.f32.mrf.mxu0  ;;  %v708_v22 = vpop.f32.mrf.mxu1  ;;  %1667 = vmatmul.msk.f32.gmra.mxu2 %vm456_vm0, %v564_v20 }
  0xfa   : > { %v2294_v29 = vadd.f32 %v708_v22, %v658_v21 }
  0xfc   : > { %v776_v31 = vpop.f32.mrf.mxu2 }
  0xfd   : > { %1676 = vmatmul.msk.f32.gmra.mxu3 %vm456_vm0, %v2194_v26  ;;  %v587_v26 = vsel %vm550_vm5, 0.0, %v575_v41  ;;  %v522_v41 = vrot.slane %v2186_v23, 7 }
  0xff   : > { %1656 = vmatmul.msk.f32.gmra.mxu1 %vm456_vm0, %v2080_v59 }
 0x100   : > { %v826_v33 = vpop.f32.mrf.mxu3 }
 0x101   : > { %v2304_v28 = vadd.f32 %v826_v33, %v776_v31  ;;  %v879_v35 = vpop.f32.mrf.mxu0  ;;  %v929_v36 = vpop.f32.mrf.mxu1  ;;  %1668 = vmatmul.msk.f32.gmra.mxu2 %vm456_vm0, %v587_v26 }
 0x102   : > { %v930_v18 = vadd.f32 %v929_v36, %v879_v35  ;;  %v526_v35 = vsel %vm524_vm3, %v521_v61, %v522_v41 }
 0x103   : > { %v547_v36 = vsel %vm510_vm2, 0.0, %v526_v35 }
 0x104   : > { %v779_v62 = vpop.f32.mrf.mxu2  ;;  %961 = vrot.lane.b32.xlu0 %v930_v18, %s1782_s16  ;;  %1647 = vmatmul.msk.f32.gmra.mxu0 %vm456_vm0, %v547_v36 }
 0x105   : > { %1677 = vmatmul.msk.f32.gmra.mxu3 %vm456_vm0, %v2211_v30 }
 0x107   : > { %1657 = vmatmul.msk.f32.gmra.mxu1 %vm456_vm0, %v2102_v2 }
 0x108   : > { %v829_v39 = vpop.f32.mrf.mxu3 }
 0x109   : > { %v2314_v47 = vadd.f32 %v829_v39, %v779_v62  ;;  %v882_v5 = vpop.f32.mrf.mxu0  ;;  %v932_v40 = vpop.f32.mrf.mxu1 }
 0x10a   : > { %v933_v43 = vadd.f32 %v932_v40, %v882_v5 }
 0x10c   : > { %v1051_v44 = vpop.f32.mrf.mxu2  ;;  %963 = vrot.lane.b32.xlu0 %v933_v43, %s1782_s16 }
 0x110   : > { %v1095_v30 = vpop.f32.mrf.mxu3 }
 0x111   : > { %v2321_v46 = vadd.f32 %v1095_v30, %v1051_v44  ;;  %v885_v48 = vpop.f32.mrf.mxu0  ;;  %v935_v51 = vpop.f32.mrf.mxu1 }
 0x112   : > { %v936_v52 = vadd.f32 %v935_v51, %v885_v48 }
 0x114   : > { %v1054_v54 = vpop.f32.mrf.mxu2  ;;  %965 = vrot.lane.b32.xlu1 %v936_v52, %s1782_s16 }
 0x118   : > { %v1098_v50 = vpop.f32.mrf.mxu3 }
 0x119   : > { %v2326_v55 = vadd.f32 %v1098_v50, %v1054_v54  ;;  %v888_v58 = vpop.f32.mrf.mxu0  ;;  %v938_v63 = vpop.f32.mrf.mxu1  ;;  %v525_v50 = vsel %vm524_vm3, %v522_v41, %v523_v27 }
 0x11a   : > { %v939_v1 = vadd.f32 %v938_v63, %v888_v58  ;;  %1648 = vmatmul.msk.f32.gmra.mxu0 %vm456_vm0, %v525_v50 }
 0x11c   : > { %v1057_v3 = vpop.f32.mrf.mxu2  ;;  %967 = vrot.lane.b32.xlu1 %v939_v1, %s1782_s16 }
 0x120   : > { %v1101_v4 = vpop.f32.mrf.mxu3 }
 0x121   : > { %v2331_v56 = vadd.f32 %v1101_v4, %v1057_v3  ;;  %v891_v6 = vpop.f32.mrf.mxu0  ;;  %v941_v8 = vpop.f32.mrf.mxu1 }
 0x122   : > { %v942_v9 = vadd.f32 %v941_v8, %v891_v6 }
 0x124   : > { %v1060_v11 = vpop.f32.mrf.mxu2  ;;  %969 = vrot.lane.b32.xlu2 %v942_v9, %s1782_s16 }
 0x128   : > { %v1104_v12 = vpop.f32.mrf.mxu3 }
 0x129   : > { %v2336_v59 = vadd.f32 %v1104_v12, %v1060_v11  ;;  %v894_v13 = vpop.f32.mrf.mxu0  ;;  %v944_v14 = vpop.f32.mrf.mxu1  ;;  %v2370_v12 = vld [vmem:[%s2484_s6] ss:$0 sm:$0xff] }
 0x12a   : > { %v945_v16 = vadd.f32 %v944_v14, %v894_v13 }
 0x12c   : > { %v1063_v17 = vpop.f32.mrf.mxu2  ;;  %971 = vrot.lane.b32.xlu2 %v945_v16, %s1782_s16 }
 0x130   : > { %v1107_v19 = vpop.f32.mrf.mxu3 }
 0x131   : > { %v2339_v20 = vadd.f32 %v1107_v19, %v1063_v17  ;;  %v897_v21 = vpop.f32.mrf.mxu0  ;;  %v947_v2 = vpop.f32.mrf.mxu1 }
 0x132   : > { %v948_v22 = vadd.f32 %v947_v2, %v897_v21 }
 0x134   : > { %v1066_v31 = vpop.f32.mrf.mxu2  ;;  %973 = vrot.lane.b32.xlu0 %v948_v22, %s1782_s16 }
 0x138   : > { %v1110_v33 = vpop.f32.mrf.mxu3 }
 0x139   : > { %v2343_v26 = vadd.f32 %v1110_v33, %v1066_v31  ;;  %v900_v18 = vpop.f32.mrf.mxu0  ;;  %v950_v62 = vpop.f32.mrf.mxu1 }
 0x13a   : > { %v951_v39 = vadd.f32 %v950_v62, %v900_v18 }
 0x13c   : > { %v1069_v23 = vpop.f32.mrf.mxu2  ;;  %975 = vrot.lane.b32.xlu1 %v951_v39, %s1782_s16 }
 0x140   : > { %v1113_v5 = vpop.f32.mrf.mxu3 }
 0x141   : > { %v2353_v40 = vadd.f32 %v1113_v5, %v1069_v23 }
 0x144   : > { %v1072_v43 = vpop.f32.mrf.mxu2 }
 0x148   : > { %v1116_v44 = vpop.f32.mrf.mxu3 }
 0x149   : > { %v2355_v60 = vadd.f32 %v1116_v44, %v1072_v43 }
 0x14c   : > { %v1247_v30 = vpop.f32.mrf.mxu2 }
 0x150   : > { %v1291_v61 = vpop.f32.mrf.mxu3 }
 0x151   : > { %v1292_v48 = vadd.f32 %v1291_v61, %v1247_v30 }
 0x153   : > { %1323 = vrot.lane.b32.xlu2 %v1292_v48, %s1782_s16 }
 0x154   : > { %v1250_v51 = vpop.f32.mrf.mxu2 }
 0x158   : > { %v1294_v52 = vpop.f32.mrf.mxu3 }
 0x159   : > { %v1295_v54 = vadd.f32 %v1294_v52, %v1250_v51 }
 0x15b   : > { %1325 = vrot.lane.b32.xlu0 %v1295_v54, %s1782_s16 }
 0x15c   : > { %v1253_v58 = vpop.f32.mrf.mxu2 }
 0x160   : > { %v1297_v63 = vpop.f32.mrf.mxu3 }
 0x161   : > { %v1298_v1 = vadd.f32 %v1297_v63, %v1253_v58 }
 0x163   : > { %1327 = vrot.lane.b32.xlu1 %v1298_v1, %s1782_s16 }
 0x164   : > { %v1256_v3 = vpop.f32.mrf.mxu2 }
 0x168   : > { %v1300_v4 = vpop.f32.mrf.mxu3 }
 0x169   : > { %v1301_v6 = vadd.f32 %v1300_v4, %v1256_v3 }
 0x16b   : > { %1329 = vrot.lane.b32.xlu2 %v1301_v6, %s1782_s16 }
 0x16c   : > { %v1259_v8 = vpop.f32.mrf.mxu2 }
 0x170   : > { %v1303_v9 = vpop.f32.mrf.mxu3 }
 0x171   : > { %v1304_v11 = vadd.f32 %v1303_v9, %v1259_v8 }
 0x173   : > { %1331 = vrot.lane.b32.xlu0 %v1304_v11, %s1782_s16 }
 0x174   : > { %v1262_v24 = vpop.f32.mrf.mxu2 }
 0x176   : > { %v962_v13 = vpop.permute.xlu0 %961 }
 0x177   : > { %v985_v14 = vsel %vm456_vm0, %v2228_v42, %v962_v13 }
 0x178   : > { %v1306_v25 = vpop.f32.mrf.mxu3  ;;  %v993_v16 = vadd.f32 %v985_v14, %v2221_v34 }
 0x179   : > { %v1307_v27 = vadd.f32 %v1306_v25, %v1262_v24 }
 0x17a   : > { %v1004_v17 = vadd.f32 %v2370_v12, %v993_v16 }
 0x17b   : > { %1333 = vrot.lane.b32.xlu1 %v1307_v27, %s1782_s16 }
 0x17c   : > { %1013 = vst.msk [vmem:[%s1900_s12] sm:$0xff] %vm1012_vm6, %v1004_v17  ;;  %v1265_v19 = vpop.f32.mrf.mxu2 }
 0x17e   : > { %v970_v22 = vpop.permute.xlu2 %969  ;;  %v964_v41 = vpop.permute.xlu0 %963 }
 0x17f   : > { %v989_v31 = vsel %vm456_vm0, %v2272_v32, %v970_v22  ;;  %v986_v42 = vsel %vm456_vm0, %v2234_v49, %v964_v41 }
 0x180   : > { %v1309_v21 = vpop.f32.mrf.mxu3  ;;  %v997_v34 = vadd.f32 %v989_v31, %v2246_v0  ;;  %v994_v33 = vadd.f32 %v986_v42, %v2226_v38 }
 0x181   : > { %v1310_v2 = vadd.f32 %v1309_v21, %v1265_v19 }
 0x182   : > { %v1008_v35 = vadd.f32 %v2370_v12, %v997_v34  ;;  %v1005_v36 = vadd.f32 %v2370_v12, %v994_v33 }
 0x183   : > { %1335 = vrot.lane.b32.xlu2 %v1310_v2, %s1782_s16 }
 0x184   : > { %1017 = vst.msk [vmem:[%s1900_s12 + $0x40] sm:$0xff] %vm1012_vm6, %v1008_v35  ;;  %v1268_v18 = vpop.f32.mrf.mxu2 }
 0x185   : > { %1014 = vst.msk [vmem:[%s1900_s12 + $0x8] sm:$0xff] %vm1012_vm6, %v1005_v36 }
 0x186   : > { %v972_v49 = vpop.permute.xlu2 %971  ;;  %v966_v39 = vpop.permute.xlu1 %965 }
 0x187   : > { %v990_v0 = vsel %vm456_vm0, %v2285_v37, %v972_v49  ;;  %v987_v38 = vsel %vm456_vm0, %v2241_v57, %v966_v39 }
 0x188   : > { %v1312_v62 = vpop.f32.mrf.mxu3  ;;  %v998_v23 = vadd.f32 %v990_v0, %v2266_v10  ;;  %v995_v5 = vadd.f32 %v987_v38, %v2232_v45  ;;  %v1149_v45 = vpop.f32.mrf.mxu0 }
 0x189   : > { %v1313_v32 = vadd.f32 %v1312_v62, %v1268_v18  ;;  %v1193_v10 = vpop.f32.mrf.mxu1 }
 0x18a   : > { %v1009_v43 = vadd.f32 %v2370_v12, %v998_v23  ;;  %v1006_v44 = vadd.f32 %v2370_v12, %v995_v5  ;;  %v1194_v54 = vadd.f32 %v1193_v10, %v1149_v45 }
 0x18b   : > { %1337 = vrot.lane.b32.xlu0 %v1313_v32, %s1782_s16 }
 0x18c   : > { %1018 = vst.msk [vmem:[%s1900_s12 + $0x48] sm:$0xff] %vm1012_vm6, %v1009_v43 }
 0x18d   : > { %1015 = vst.msk [vmem:[%s1900_s12 + $0x20] sm:$0xff] %vm1012_vm6, %v1006_v44 }
 0x18e   : > { %v968_v30 = vpop.permute.xlu1 %967 }
 0x18f   : > { %v988_v37 = vsel %vm456_vm0, %v2260_v7, %v968_v30 }
 0x190   : > { %v996_v57 = vadd.f32 %v988_v37, %v2239_v53  ;;  %v1152_v48 = vpop.f32.mrf.mxu0 }
 0x191   : > { %v1196_v51 = vpop.f32.mrf.mxu1 }
 0x192   : > { %v1007_v61 = vadd.f32 %v2370_v12, %v996_v57 }
 0x194   : > { %1016 = vst.msk [vmem:[%s1900_s12 + $0x28] sm:$0xff] %vm1012_vm6, %v1007_v61 }
 0x198   : > { %v1155_v1 = vpop.f32.mrf.mxu0 }
 0x199   : > { %v1199_v4 = vpop.f32.mrf.mxu1 }
 0x19a   : > { %v1200_v31 = vadd.f32 %v1199_v4, %v1155_v1 }
 0x1a0   : > { %v1158_v11 = vpop.f32.mrf.mxu0 }
 0x1a6   : > { %v974_v52 = vpop.permute.xlu0 %973 }
 0x1a7   : > { %v991_v50 = vsel %vm456_vm0, %v2304_v28, %v974_v52 }
 0x1a8   : > { %v999_v7 = vadd.f32 %v991_v50, %v2278_v15  ;;  %v1161_v25 = vpop.f32.mrf.mxu0 }
 0x1aa   : > { %v1010_v53 = vadd.f32 %v2370_v12, %v999_v7 }
 0x1ac   : > { %1019 = vst.msk [vmem:[%s1900_s12 + $0x60] sm:$0xff] %vm1012_vm6, %v1010_v53 }
 0x1ad   : > { %v1324_v58 = vpop.permute.xlu2 %1323 }
 0x1ae   : > { %v1347_v63 = vsel %vm456_vm0, %v1194_v54, %v1324_v58  ;;  %v976_v8 = vpop.permute.xlu1 %975 }
 0x1af   : > { %v1355_v3 = vadd.f32 %v1347_v63, %v2321_v46  ;;  %v992_v15 = vsel %vm456_vm0, %v2314_v47, %v976_v8  ;;  %v1202_v46 = vpop.f32.mrf.mxu1  ;;  %v1197_v47 = vadd.f32 %v1196_v51, %v1152_v48 }
 0x1b0   : > { %v1000_v28 = vadd.f32 %v992_v15, %v2294_v29  ;;  %v1203_v24 = vadd.f32 %v1202_v46, %v1158_v11  ;;  %v1164_v29 = vpop.f32.mrf.mxu0 }
 0x1b1   : > { %v1363_v6 = vadd.f32 %v2370_v12, %v1355_v3 }
 0x1b2   : > { %v1011_v9 = vadd.f32 %v2370_v12, %v1000_v28 }
 0x1b3   : > { %1678 = vst.msk [vmem:[%s1900_s12 + $0x10] sm:$0xff] %vm1012_vm6, %v1363_v6 }
 0x1b4   : > { %1020 = vst.msk [vmem:[%s1900_s12 + $0x68] sm:$0xff] %vm1012_vm6, %v1011_v9 }
 0x1b7   : > { %v1205_v27 = vpop.f32.mrf.mxu1 }
 0x1b8   : > { %v1167_v33 = vpop.f32.mrf.mxu0  ;;  %v1206_v39 = vadd.f32 %v1205_v27, %v1161_v25 }
 0x1bf   : > { %v1208_v21 = vpop.f32.mrf.mxu1 }
 0x1c0   : > { %v1209_v5 = vadd.f32 %v1208_v21, %v1164_v29  ;;  %v1170_v37 = vpop.f32.mrf.mxu0 }
 0x1c5   : > { %v1330_v13 = vpop.permute.xlu2 %1329 }
 0x1c6   : > { %v1350_v14 = vsel %vm456_vm0, %v1203_v24, %v1330_v13 }
 0x1c7   : > { %v1358_v16 = vadd.f32 %v1350_v14, %v2336_v59  ;;  %v1211_v35 = vpop.f32.mrf.mxu1 }
 0x1c8   : > { %v1212_v18 = vadd.f32 %v1211_v35, %v1167_v33 }
 0x1c9   : > { %v1366_v17 = vadd.f32 %v2370_v12, %v1358_v16 }
 0x1cb   : > { %1681 = vst.msk [vmem:[%s1900_s12 + $0x38] sm:$0xff] %vm1012_vm6, %v1366_v17 }
 0x1cd   : > { %v1326_v19 = vpop.permute.xlu0 %1325 }
 0x1ce   : > { %v1348_v2 = vsel %vm456_vm0, %v1197_v47, %v1326_v19 }
 0x1cf   : > { %v1356_v22 = vadd.f32 %v1348_v2, %v2326_v55  ;;  %v1214_v57 = vpop.f32.mrf.mxu1 }
 0x1d0   : > { %v1215_v61 = vadd.f32 %v1214_v57, %v1170_v37 }
 0x1d1   : > { %v1364_v41 = vadd.f32 %v2370_v12, %v1356_v22 }
 0x1d3   : > { %1679 = vst.msk [vmem:[%s1900_s12 + $0x18] sm:$0xff] %vm1012_vm6, %v1364_v41 }
 0x1d5   : > { %v1328_v59 = vpop.permute.xlu1 %1327 }
 0x1d6   : > { %v1349_v42 = vsel %vm456_vm0, %v1200_v31, %v1328_v59 }
 0x1d7   : > { %v1357_v34 = vadd.f32 %v1349_v42, %v2331_v56 }
 0x1d9   : > { %v1365_v36 = vadd.f32 %v2370_v12, %v1357_v34 }
 0x1db   : > { %1680 = vst.msk [vmem:[%s1900_s12 + $0x30] sm:$0xff] %vm1012_vm6, %v1365_v36 }
 0x1dd   : > { %v1336_v55 = vpop.permute.xlu2 %1335 }
 0x1de   : > { %v1353_v62 = vsel %vm456_vm0, %v1212_v18, %v1336_v55 }
 0x1df   : > { %v1361_v32 = vadd.f32 %v1353_v62, %v2353_v40 }
 0x1e1   : > { %v1369_v49 = vadd.f32 %v2370_v12, %v1361_v32 }
 0x1e3   : > { %1684 = vst.msk [vmem:[%s1900_s12 + $0x70] sm:$0xff] %vm1012_vm6, %v1369_v49 }
 0x1e5   : > { %v1332_v56 = vpop.permute.xlu0 %1331 }
 0x1e6   : > { %v1351_v0 = vsel %vm456_vm0, %v1206_v39, %v1332_v56 }
 0x1e7   : > { %v1359_v38 = vadd.f32 %v1351_v0, %v2339_v20 }
 0x1e9   : > { %v1367_v23 = vadd.f32 %v2370_v12, %v1359_v38 }
 0x1eb   : > { %1682 = vst.msk [vmem:[%s1900_s12 + $0x50] sm:$0xff] %vm1012_vm6, %v1367_v23 }
 0x1ed   : > { %v1334_v43 = vpop.permute.xlu1 %1333 }
 0x1ee   : > { %v1352_v44 = vsel %vm456_vm0, %v1209_v5, %v1334_v43 }
 0x1ef   : > { %v1360_v40 = vadd.f32 %v1352_v44, %v2343_v26 }
 0x1f1   : > { %v1368_v30 = vadd.f32 %v2370_v12, %v1360_v40 }
 0x1f3   : > { %1683 = vst.msk [vmem:[%s1900_s12 + $0x58] sm:$0xff] %vm1012_vm6, %v1368_v30 }
 0x1fd   : > { %v1338_v45 = vpop.permute.xlu0 %1337 }
 0x1fe   : > { %v1354_v20 = vsel %vm456_vm0, %v1215_v61, %v1338_v45 }
 0x1ff   : > { %v1362_v10 = vadd.f32 %v1354_v20, %v2355_v60 }
 0x201   : > { %v1370_v48 = vadd.f32 %v2370_v12, %v1362_v10 }
 0x203   : > { %1685 = vst.msk [vmem:[%s1900_s12 + $0x78] sm:$0xff] %vm1012_vm6, %v1370_v48 }
 0x204 PF: > { %s17_s28 = sadd.s32 1, %s1778_s28   ;;  %s2488_s24 = smov %s1770_s26 }
 0x205   : > { %p14_p0 = scmp.ge.s32.totalorder %s17_s28, 10   ;;  %s2489_s25 = smov %s1774_s27 }
 0x206   : > { %s2490_s26 = smov %s2493_s29  ;;  %s2491_s27 = smov %s2497_s30 }
 0x207   :  { %16 = sbr.rel (!%p14_p0) target bundleno = 3 (0x3), region = 113 }

</bundles_post_ra>
